<compile_context>
chip_gen: v7x
topology: tpu7x:2x2x1
jax: 0.10.0
libtpu: 0.0.40
codegen_flags: <defaults>
</compile_context>

<pallas_src>
import functools

import numpy as np
import jax
import jax.numpy as jnp
from jax.experimental import pallas as pl
from jax.experimental.pallas import tpu as pltpu

# ----------------------------- config ----------------------------------------
VOCAB_SIZE = 64
VOCAB_PAD  = 128                      # lane-dense LM head (wrapper slices back to 64)
N_EMBD     = 32
N_HEAD     = 2
HEAD_SIZE  = N_EMBD // N_HEAD         # 16
HIDDEN     = 4 * N_EMBD               # 128
N_LAYER    = 2
BLOCK_SIZE = 8                        # max sequence length
BATCH      = 2
SEQ        = 8
EPS        = 1e-5
# fused [token ; position] embedding table rows, padded to a multiple of 16
E_ROWS     = ((VOCAB_SIZE + BLOCK_SIZE + 15) // 16) * 16          # 80


# ----------------------------- slab layouts -----------------------------------
def _build_w_layout():
    """Row offsets inside the packed bf16 weight slab (all offsets 16-aligned)."""
    layout, off = {}, 0

    def add(name, rows, cols):
        nonlocal off
        assert rows % 16 == 0                      # bf16 sublane-tile alignment
        layout[name] = (off, rows, cols)
        off += rows

    add("embed", E_ROWS, N_EMBD)                   # [tok_emb(64); pos_emb(8); 0(8)]
    for l in range(N_LAYER):
        for h in range(N_HEAD):
            add(f"wq_{l}_{h}", N_EMBD, HEAD_SIZE)
            add(f"wk_{l}_{h}", N_EMBD, HEAD_SIZE)
            add(f"wv_{l}_{h}", N_EMBD, HEAD_SIZE)
        add(f"wproj_{l}", N_EMBD, N_EMBD)
        add(f"w1_{l}", N_EMBD, HIDDEN)
        add(f"w2_{l}", HIDDEN, N_EMBD)
    add("wlm", N_EMBD, VOCAB_PAD)                  # cols 64..127 zero (lane padding)
    return layout, off


def _build_b_layout():
    """Row offsets inside the f32 gain/bias slab (one 8-row-aligned row each)."""
    layout, off = {}, 0

    def add(name, cols):
        nonlocal off
        layout[name] = (off, cols)
        off += 8                                   # keep every read tile-aligned

    for l in range(N_LAYER):
        add(f"ln1_g_{l}", N_EMBD)
        add(f"ln1_b_{l}", N_EMBD)
        add(f"bproj_{l}", N_EMBD)
        add(f"ln2_g_{l}", N_EMBD)
        add(f"ln2_b_{l}", N_EMBD)
        add(f"b1_{l}", HIDDEN)
        add(f"b2_{l}", N_EMBD)
    add("lnf_g", N_EMBD)
    add("lnf_b", N_EMBD)
    add("blm", VOCAB_PAD)
    return layout, off


W_LAYOUT, W_ROWS = _build_w_layout()               # (880, 128) bf16
B_LAYOUT, B_ROWS = _build_b_layout()               # (136, 128) f32


# ----------------------------- fused kernel -----------------------------------
def gpt_fused_kernel(B, T, idx_ref, tgt_ref, w_ref, b_ref, logits_ref, loss_ref):
    f32, bf16 = jnp.float32, jnp.bfloat16
    N = B * T
    V, hs = VOCAB_SIZE, HEAD_SIZE
    scale = float(hs) ** -0.5

    def wmat(name):                                # bf16 weight block (lane offset 0)
        off, rows, cols = W_LAYOUT[name]
        return w_ref[off:off + rows, 0:cols]

    def bvec(name):                                # f32 (1, cols) gain / bias row
        off, cols = B_LAYOUT[name]
        return b_ref[off:off + 1, 0:cols]

    def layernorm(x, gname, bname):                # f32 math (no bf16 VPU on v5e)
        mu = jnp.mean(x, axis=-1, keepdims=True)
        var = jnp.mean(jnp.square(x - mu), axis=-1, keepdims=True)
        return (x - mu) * jax.lax.rsqrt(var + EPS) * bvec(gname) + bvec(bname)

    def pos_in_seq(i):                             # i mod T (T is a static Python int)
        return jnp.bitwise_and(i, T - 1) if (T & (T - 1)) == 0 else i % T

    # ---- token + position embedding: one one-hot MXU matmul against the packed
    #      [tok_emb; pos_emb] table (folds the position add into existing MXU work) ----
    idx_col = idx_ref[...]                                              # (N, 1) int32
    ecol = jax.lax.broadcasted_iota(jnp.int32, (N, E_ROWS), 1)
    erow = jax.lax.broadcasted_iota(jnp.int32, (N, E_ROWS), 0)
    hit = (ecol == idx_col) | (ecol == V + pos_in_seq(erow))
    onehot = jnp.where(hit, 1.0, 0.0).astype(bf16)                      # (N, E_ROWS)
    x = jnp.dot(onehot, wmat("embed"), preferred_element_type=f32)      # (N, C) f32

    # ---- additive block-diagonal causal mask, built once from iotas (no input) ----
    rr = jax.lax.broadcasted_iota(jnp.int32, (N, N), 0)
    cc = jax.lax.broadcasted_iota(jnp.int32, (N, N), 1)
    same_seq = (rr - pos_in_seq(rr)) == (cc - pos_in_seq(cc))
    mask_bias = jnp.where(same_seq & (rr >= cc), 0.0, -1e30)            # (N, N) f32

    nt = (((1,), (1,)), ((), ()))                  # contract last dims: q @ k^T (NT)

    # ---- transformer blocks (unrolled) ----
    for l in range(N_LAYER):
        # multi-head self-attention on ln1(x)
        xn = layernorm(x, f"ln1_g_{l}", f"ln1_b_{l}")
        xnb = xn.astype(bf16)
        poff, _, pcols = W_LAYOUT[f"wproj_{l}"]
        att = None
        for h in range(N_HEAD):
            q = jnp.dot(xnb, wmat(f"wq_{l}_{h}"), preferred_element_type=f32)
            k = jnp.dot(xnb, wmat(f"wk_{l}_{h}"), preferred_element_type=f32)
            v = jnp.dot(xnb, wmat(f"wv_{l}_{h}"), preferred_element_type=f32)
            s = jax.lax.dot_general(q.astype(bf16), k.astype(bf16),
                                    dimension_numbers=nt,
                                    preferred_element_type=f32) * scale  # (N, N)
            s = s + mask_bias
            s = s - jnp.max(s, axis=-1, keepdims=True)
            e = jnp.exp(s)
            p = e * pl.reciprocal(jnp.sum(e, axis=-1, keepdims=True), approx=True)
            o_h = jnp.dot(p.astype(bf16), v.astype(bf16),
                          preferred_element_type=f32)                    # (N, hs)
            # head-h rows of the output projection (no lane concat of head outputs)
            wp_h = w_ref[poff + h * hs: poff + (h + 1) * hs, 0:pcols]    # (hs, C)
            contrib = jnp.dot(o_h.astype(bf16), wp_h, preferred_element_type=f32)
            att = contrib if att is None else att + contrib
        x = x + att + bvec(f"bproj_{l}")

        # feed-forward on ln2(x)
        xn2 = layernorm(x, f"ln2_g_{l}", f"ln2_b_{l}")
        h1 = jnp.dot(xn2.astype(bf16), wmat(f"w1_{l}"),
                     preferred_element_type=f32) + bvec(f"b1_{l}")
        h1 = jnp.maximum(h1, 0.0)                                        # ReLU
        x = x + jnp.dot(h1.astype(bf16), wmat(f"w2_{l}"),
                        preferred_element_type=f32) + bvec(f"b2_{l}")

    # ---- final LayerNorm + lane-dense (128-col) LM head ----
    xf = layernorm(x, "lnf_g", "lnf_b")
    logits = jnp.dot(xf.astype(bf16), wmat("wlm"),
                     preferred_element_type=f32) + bvec("blm")           # (N, 128)
    logits_ref[...] = logits

    # ---- in-kernel cross-entropy over the real vocab columns 0..63 ----
    lg = logits[:, 0:V]                                                  # (N, 64)
    m = jnp.max(lg, axis=-1, keepdims=True)
    lse = m + jnp.log(jnp.sum(jnp.exp(lg - m), axis=-1, keepdims=True))  # (N, 1)
    t_onehot = jnp.where(
        jax.lax.broadcasted_iota(jnp.int32, (N, V), 1) == tgt_ref[...], 1.0, 0.0)
    picked = jnp.sum(lg * t_onehot, axis=-1, keepdims=True)              # (N, 1)
    loss_ref[...] = jnp.sum(lse - picked, axis=0, keepdims=True) * (1.0 / N)


# ----------------------------- wrapper ----------------------------------------
def gpt_forward(idx, packed, targets=None):
    """idx: (B, T) int32 -> (logits (B, T, V), loss or None)."""
    B, T = idx.shape
    assert T <= BLOCK_SIZE
    N = B * T
    idx_col = idx.reshape(N, 1).astype(jnp.int32)
    tgt = targets if targets is not None else jnp.zeros_like(idx)
    tgt_col = tgt.reshape(N, 1).astype(jnp.int32)

    vmem = pltpu.MemorySpace.VMEM
    kernel = functools.partial(gpt_fused_kernel, B, T)
    logits_pad, loss2d = pl.pallas_call(
        kernel,
        out_shape=(jax.ShapeDtypeStruct((N, VOCAB_PAD), jnp.float32),
                   jax.ShapeDtypeStruct((1, 1), jnp.float32)),
        in_specs=[pl.BlockSpec(memory_space=vmem)] * 4,
        out_specs=(pl.BlockSpec(memory_space=vmem),
                   pl.BlockSpec(memory_space=vmem)),
    )(idx_col, tgt_col, packed["w"], packed["b"])

    logits = logits_pad[:, :VOCAB_SIZE].reshape(B, T, VOCAB_SIZE)
    loss = loss2d[0, 0] if targets is not None else None
    return logits, loss


# ----------------------------- parameter init / packing ------------------------
def init_params(key):
    """Initialize weights (std=0.02 normals, zero biases, unit LN gains) and pack
    them host-side (once) into the two slabs the kernel consumes."""
    ks = iter(jax.random.split(key, 64))

    def normal(shape):
        return np.asarray(0.02 * jax.random.normal(next(ks), shape, dtype=jnp.float32))

    w = np.zeros((W_ROWS, 128), np.float32)

    def put_w(name, arr):
        off, _, _ = W_LAYOUT[name]
        r, c = arr.shape
        w[off:off + r, :c] = arr

    put_w("embed", np.concatenate([normal((VOCAB_SIZE, N_EMBD)),      # token table
                                   normal((BLOCK_SIZE, N_EMBD))], 0))  # position table
    for l in range(N_LAYER):
        for h in range(N_HEAD):
            put_w(f"wq_{l}_{h}", normal((N_EMBD, HEAD_SIZE)))
            put_w(f"wk_{l}_{h}", normal((N_EMBD, HEAD_SIZE)))
            put_w(f"wv_{l}_{h}", normal((N_EMBD, HEAD_SIZE)))
        put_w(f"wproj_{l}", normal((N_EMBD, N_EMBD)))
        put_w(f"w1_{l}", normal((N_EMBD, HIDDEN)))
        put_w(f"w2_{l}", normal((HIDDEN, N_EMBD)))
    put_w("wlm", normal((N_EMBD, VOCAB_SIZE)))       # cols 64..127 stay zero (padding)

    b = np.zeros((B_ROWS, 128), np.float32)

    def put_b(name, vec):
        off, _ = B_LAYOUT[name]
        b[off, :len(vec)] = vec

    ones_c = np.ones(N_EMBD, np.float32)
    for l in range(N_LAYER):
        put_b(f"ln1_g_{l}", ones_c)
        put_b(f"ln2_g_{l}", ones_c)
    put_b("lnf_g", ones_c)
    # all linear biases and LayerNorm betas are zero-initialized (slab already zero)

    return {"w": jnp.asarray(w, dtype=jnp.bfloat16),   # bf16 matmul operands
            "b": jnp.asarray(b, dtype=jnp.float32)}    # f32 vector-math operands


# ----------------------------- main --------------------------------------------
if __name__ == "__main__":
    key = jax.random.PRNGKey(0)
    pkey, ikey, tkey = jax.random.split(key, 3)

    packed = init_params(pkey)
    idx = jax.random.randint(ikey, (BATCH, SEQ), 0, VOCAB_SIZE, dtype=jnp.int32)
    targets = jax.random.randint(tkey, (BATCH, SEQ), 0, VOCAB_SIZE, dtype=jnp.int32)

    fwd = jax.jit(gpt_forward)
    logits, loss = fwd(idx, packed, targets)
    logits = jax.block_until_ready(logits)
    loss = jax.block_until_ready(loss)

    assert logits.shape == (BATCH, SEQ, VOCAB_SIZE)
    assert bool(jnp.isfinite(loss))
    print("KERNEL_OK")
</pallas_src>

<mosaic_0001>
module attributes {stable_mosaic.version = 11 : i64} {
  func.func @gpt_fused_kernel(%arg0: memref<16x1xi32, #tpu.memory_space<vmem>>, %arg1: memref<16x1xi32, #tpu.memory_space<vmem>>, %arg2: memref<880x128xbf16, #tpu.memory_space<vmem>>, %arg3: memref<136x128xf32, #tpu.memory_space<vmem>>, %arg4: memref<16x128xf32, #tpu.memory_space<vmem>>, %arg5: memref<1x1xf32, #tpu.memory_space<vmem>>) attributes {dimension_semantics = [], scalar_prefetch = 0 : i64, scratch_operands = 0 : i64, tpu.core_type = #tpu.core_type<tc>} {
    %c0 = arith.constant 0 : index
    %c0_0 = arith.constant 0 : index
    %0 = vector.load %arg0[%c0, %c0_0] : memref<16x1xi32, #tpu.memory_space<vmem>>, vector<16x1xi32>
    %1 = tpu.iota {dimensions = array<i32: 1>} : vector<16x80xi32>
    %2 = tpu.iota {dimensions = array<i32: 0>} : vector<16x80xi32>
    %3 = vector.broadcast %0 : vector<16x1xi32> to vector<16x80xi32>
    %4 = arith.cmpi eq, %1, %3 : vector<16x80xi32>
    %c7_i32 = arith.constant 7 : i32
    %5 = vector.broadcast %c7_i32 : i32 to vector<16x80xi32>
    %6 = arith.andi %2, %5 : vector<16x80xi32>
    %c64_i32 = arith.constant 64 : i32
    %7 = vector.broadcast %c64_i32 : i32 to vector<16x80xi32>
    %8 = arith.addi %7, %6 : vector<16x80xi32>
    %9 = arith.cmpi eq, %1, %8 : vector<16x80xi32>
    %10 = arith.ori %4, %9 : vector<16x80xi1>
    %cst = arith.constant 1.000000e+00 : f32
    %cst_1 = arith.constant 0.000000e+00 : f32
    %11 = vector.broadcast %cst : f32 to vector<16x80xf32>
    %12 = vector.broadcast %cst_1 : f32 to vector<16x80xf32>
    %13 = arith.select %10, %11, %12 : vector<16x80xi1>, vector<16x80xf32>
    %14 = arith.truncf %13 : vector<16x80xf32> to vector<16x80xbf16>
    %c0_2 = arith.constant 0 : index
    %c0_3 = arith.constant 0 : index
    %15 = vector.load %arg2[%c0_2, %c0_3] : memref<880x128xbf16, #tpu.memory_space<vmem>>, vector<80x32xbf16>
    %cst_4 = arith.constant dense<0.000000e+00> : vector<16x32xf32>
    %16 = tpu.matmul %14, %15, %cst_4 {dimension_numbers = #tpu.dot_dimension_numbers<[1], [0], [0], [1], [0, 0, 1, 1], [], []>} : vector<16x80xbf16>, vector<80x32xbf16>, vector<16x32xf32> -> vector<16x32xf32>
    %17 = tpu.iota {dimensions = array<i32: 0>} : vector<16x16xi32>
    %18 = tpu.iota {dimensions = array<i32: 1>} : vector<16x16xi32>
    %c7_i32_5 = arith.constant 7 : i32
    %19 = vector.broadcast %c7_i32_5 : i32 to vector<16x16xi32>
    %20 = arith.andi %17, %19 : vector<16x16xi32>
    %21 = arith.subi %17, %20 : vector<16x16xi32>
    %c7_i32_6 = arith.constant 7 : i32
    %22 = vector.broadcast %c7_i32_6 : i32 to vector<16x16xi32>
    %23 = arith.andi %18, %22 : vector<16x16xi32>
    %24 = arith.subi %18, %23 : vector<16x16xi32>
    %25 = arith.cmpi eq, %21, %24 : vector<16x16xi32>
    %26 = arith.cmpi sge, %17, %18 : vector<16x16xi32>
    %27 = arith.andi %25, %26 : vector<16x16xi1>
    %cst_7 = arith.constant 0.000000e+00 : f32
    %cst_8 = arith.constant -1.000000e+30 : f32
    %28 = vector.broadcast %cst_7 : f32 to vector<16x16xf32>
    %29 = vector.broadcast %cst_8 : f32 to vector<16x16xf32>
    %30 = arith.select %27, %28, %29 : vector<16x16xi1>, vector<16x16xf32>
    %cst_9 = arith.constant dense<0.000000e+00> : vector<16xf32>
    %31 = vector.multi_reduction <add>, %16, %cst_9 [1] : vector<16x32xf32> to vector<16xf32>
    %32 = vector.shape_cast %31 : vector<16xf32> to vector<16x1xf32>
    %cst_10 = arith.constant 3.200000e+01 : f32
    %33 = vector.broadcast %cst_10 : f32 to vector<16x1xf32>
    %34 = arith.divf %32, %33 : vector<16x1xf32>
    %35 = vector.broadcast %34 : vector<16x1xf32> to vector<16x32xf32>
    %36 = arith.subf %16, %35 : vector<16x32xf32>
    %37 = arith.mulf %36, %36 : vector<16x32xf32>
    %cst_11 = arith.constant dense<0.000000e+00> : vector<16xf32>
    %38 = vector.multi_reduction <add>, %37, %cst_11 [1] : vector<16x32xf32> to vector<16xf32>
    %39 = vector.shape_cast %38 : vector<16xf32> to vector<16x1xf32>
    %cst_12 = arith.constant 3.200000e+01 : f32
    %40 = vector.broadcast %cst_12 : f32 to vector<16x1xf32>
    %41 = arith.divf %39, %40 : vector<16x1xf32>
    %42 = vector.broadcast %34 : vector<16x1xf32> to vector<16x32xf32>
    %43 = arith.subf %16, %42 : vector<16x32xf32>
    %cst_13 = arith.constant 9.99999974E-6 : f32
    %44 = vector.broadcast %cst_13 : f32 to vector<16x1xf32>
    %45 = arith.addf %41, %44 : vector<16x1xf32>
    %46 = math.rsqrt %45 : vector<16x1xf32>
    %47 = vector.broadcast %46 : vector<16x1xf32> to vector<16x32xf32>
    %48 = arith.mulf %43, %47 : vector<16x32xf32>
    %c0_14 = arith.constant 0 : index
    %c0_15 = arith.constant 0 : index
    %49 = vector.load %arg3[%c0_14, %c0_15] : memref<136x128xf32, #tpu.memory_space<vmem>>, vector<1x32xf32>
    %50 = vector.broadcast %49 : vector<1x32xf32> to vector<16x32xf32>
    %51 = arith.mulf %48, %50 : vector<16x32xf32>
    %c8 = arith.constant 8 : index
    %c0_16 = arith.constant 0 : index
    %52 = vector.load %arg3[%c8, %c0_16] : memref<136x128xf32, #tpu.memory_space<vmem>>, vector<1x32xf32>
    %53 = vector.broadcast %52 : vector<1x32xf32> to vector<16x32xf32>
    %54 = arith.addf %51, %53 : vector<16x32xf32>
    %55 = arith.truncf %54 : vector<16x32xf32> to vector<16x32xbf16>
    %c80 = arith.constant 80 : index
    %c0_17 = arith.constant 0 : index
    %56 = vector.load %arg2[%c80, %c0_17] : memref<880x128xbf16, #tpu.memory_space<vmem>>, vector<32x16xbf16>
    %cst_18 = arith.constant dense<0.000000e+00> : vector<16x16xf32>
    %57 = tpu.matmul %55, %56, %cst_18 {dimension_numbers = #tpu.dot_dimension_numbers<[1], [0], [0], [1], [0, 0, 1, 1], [], []>} : vector<16x32xbf16>, vector<32x16xbf16>, vector<16x16xf32> -> vector<16x16xf32>
    %c112 = arith.constant 112 : index
    %c0_19 = arith.constant 0 : index
    %58 = vector.load %arg2[%c112, %c0_19] : memref<880x128xbf16, #tpu.memory_space<vmem>>, vector<32x16xbf16>
    %cst_20 = arith.constant dense<0.000000e+00> : vector<16x16xf32>
    %59 = tpu.matmul %55, %58, %cst_20 {dimension_numbers = #tpu.dot_dimension_numbers<[1], [0], [0], [1], [0, 0, 1, 1], [], []>} : vector<16x32xbf16>, vector<32x16xbf16>, vector<16x16xf32> -> vector<16x16xf32>
    %c144 = arith.constant 144 : index
    %c0_21 = arith.constant 0 : index
    %60 = vector.load %arg2[%c144, %c0_21] : memref<880x128xbf16, #tpu.memory_space<vmem>>, vector<32x16xbf16>
    %cst_22 = arith.constant dense<0.000000e+00> : vector<16x16xf32>
    %61 = tpu.matmul %55, %60, %cst_22 {dimension_numbers = #tpu.dot_dimension_numbers<[1], [0], [0], [1], [0, 0, 1, 1], [], []>} : vector<16x32xbf16>, vector<32x16xbf16>, vector<16x16xf32> -> vector<16x16xf32>
    %62 = arith.truncf %57 : vector<16x16xf32> to vector<16x16xbf16>
    %63 = arith.truncf %59 : vector<16x16xf32> to vector<16x16xbf16>
    %cst_23 = arith.constant dense<0.000000e+00> : vector<16x16xf32>
    %64 = tpu.matmul %62, %63, %cst_23 {dimension_numbers = #tpu.dot_dimension_numbers<[1], [1], [0], [0], [0, 0, 1, 0], [], []>} : vector<16x16xbf16>, vector<16x16xbf16>, vector<16x16xf32> -> vector<16x16xf32>
    %cst_24 = arith.constant 2.500000e-01 : f32
    %65 = vector.broadcast %cst_24 : f32 to vector<16x16xf32>
    %66 = arith.mulf %64, %65 : vector<16x16xf32>
    %67 = arith.addf %66, %30 : vector<16x16xf32>
    %cst_25 = arith.constant dense<0xFF800000> : vector<16xf32>
    %68 = vector.multi_reduction <maximumf>, %67, %cst_25 [1] : vector<16x16xf32> to vector<16xf32>
    %69 = vector.shape_cast %68 : vector<16xf32> to vector<16x1xf32>
    %70 = vector.broadcast %69 : vector<16x1xf32> to vector<16x16xf32>
    %71 = arith.subf %67, %70 : vector<16x16xf32>
    %72 = math.exp %71 : vector<16x16xf32>
    %cst_26 = arith.constant dense<0.000000e+00> : vector<16xf32>
    %73 = vector.multi_reduction <add>, %72, %cst_26 [1] : vector<16x16xf32> to vector<16xf32>
    %74 = vector.shape_cast %73 : vector<16xf32> to vector<16x1xf32>
    %75 = tpu.reciprocal %74 {approx = true} : vector<16x1xf32> -> vector<16x1xf32>
    %76 = vector.broadcast %75 : vector<16x1xf32> to vector<16x16xf32>
    %77 = arith.mulf %72, %76 : vector<16x16xf32>
    %78 = arith.truncf %77 : vector<16x16xf32> to vector<16x16xbf16>
    %79 = arith.truncf %61 : vector<16x16xf32> to vector<16x16xbf16>
    %cst_27 = arith.constant dense<0.000000e+00> : vector<16x16xf32>
    %80 = tpu.matmul %78, %79, %cst_27 {dimension_numbers = #tpu.dot_dimension_numbers<[1], [0], [0], [1], [0, 0, 1, 1], [], []>} : vector<16x16xbf16>, vector<16x16xbf16>, vector<16x16xf32> -> vector<16x16xf32>
    %c272 = arith.constant 272 : index
    %c0_28 = arith.constant 0 : index
    %81 = vector.load %arg2[%c272, %c0_28] : memref<880x128xbf16, #tpu.memory_space<vmem>>, vector<16x32xbf16>
    %82 = arith.truncf %80 : vector<16x16xf32> to vector<16x16xbf16>
    %cst_29 = arith.constant dense<0.000000e+00> : vector<16x32xf32>
    %83 = tpu.matmul %82, %81, %cst_29 {dimension_numbers = #tpu.dot_dimension_numbers<[1], [0], [0], [1], [0, 0, 1, 1], [], []>} : vector<16x16xbf16>, vector<16x32xbf16>, vector<16x32xf32> -> vector<16x32xf32>
    %c176 = arith.constant 176 : index
    %c0_30 = arith.constant 0 : index
    %84 = vector.load %arg2[%c176, %c0_30] : memref<880x128xbf16, #tpu.memory_space<vmem>>, vector<32x16xbf16>
    %cst_31 = arith.constant dense<0.000000e+00> : vector<16x16xf32>
    %85 = tpu.matmul %55, %84, %cst_31 {dimension_numbers = #tpu.dot_dimension_numbers<[1], [0], [0], [1], [0, 0, 1, 1], [], []>} : vector<16x32xbf16>, vector<32x16xbf16>, vector<16x16xf32> -> vector<16x16xf32>
    %c208 = arith.constant 208 : index
    %c0_32 = arith.constant 0 : index
    %86 = vector.load %arg2[%c208, %c0_32] : memref<880x128xbf16, #tpu.memory_space<vmem>>, vector<32x16xbf16>
    %cst_33 = arith.constant dense<0.000000e+00> : vector<16x16xf32>
    %87 = tpu.matmul %55, %86, %cst_33 {dimension_numbers = #tpu.dot_dimension_numbers<[1], [0], [0], [1], [0, 0, 1, 1], [], []>} : vector<16x32xbf16>, vector<32x16xbf16>, vector<16x16xf32> -> vector<16x16xf32>
    %c240 = arith.constant 240 : index
    %c0_34 = arith.constant 0 : index
    %88 = vector.load %arg2[%c240, %c0_34] : memref<880x128xbf16, #tpu.memory_space<vmem>>, vector<32x16xbf16>
    %cst_35 = arith.constant dense<0.000000e+00> : vector<16x16xf32>
    %89 = tpu.matmul %55, %88, %cst_35 {dimension_numbers = #tpu.dot_dimension_numbers<[1], [0], [0], [1], [0, 0, 1, 1], [], []>} : vector<16x32xbf16>, vector<32x16xbf16>, vector<16x16xf32> -> vector<16x16xf32>
    %90 = arith.truncf %85 : vector<16x16xf32> to vector<16x16xbf16>
    %91 = arith.truncf %87 : vector<16x16xf32> to vector<16x16xbf16>
    %cst_36 = arith.constant dense<0.000000e+00> : vector<16x16xf32>
    %92 = tpu.matmul %90, %91, %cst_36 {dimension_numbers = #tpu.dot_dimension_numbers<[1], [1], [0], [0], [0, 0, 1, 0], [], []>} : vector<16x16xbf16>, vector<16x16xbf16>, vector<16x16xf32> -> vector<16x16xf32>
    %cst_37 = arith.constant 2.500000e-01 : f32
    %93 = vector.broadcast %cst_37 : f32 to vector<16x16xf32>
    %94 = arith.mulf %92, %93 : vector<16x16xf32>
    %95 = arith.addf %94, %30 : vector<16x16xf32>
    %cst_38 = arith.constant dense<0xFF800000> : vector<16xf32>
    %96 = vector.multi_reduction <maximumf>, %95, %cst_38 [1] : vector<16x16xf32> to vector<16xf32>
    %97 = vector.shape_cast %96 : vector<16xf32> to vector<16x1xf32>
    %98 = vector.broadcast %97 : vector<16x1xf32> to vector<16x16xf32>
    %99 = arith.subf %95, %98 : vector<16x16xf32>
    %100 = math.exp %99 : vector<16x16xf32>
    %cst_39 = arith.constant dense<0.000000e+00> : vector<16xf32>
    %101 = vector.multi_reduction <add>, %100, %cst_39 [1] : vector<16x16xf32> to vector<16xf32>
    %102 = vector.shape_cast %101 : vector<16xf32> to vector<16x1xf32>
    %103 = tpu.reciprocal %102 {approx = true} : vector<16x1xf32> -> vector<16x1xf32>
    %104 = vector.broadcast %103 : vector<16x1xf32> to vector<16x16xf32>
    %105 = arith.mulf %100, %104 : vector<16x16xf32>
    %106 = arith.truncf %105 : vector<16x16xf32> to vector<16x16xbf16>
    %107 = arith.truncf %89 : vector<16x16xf32> to vector<16x16xbf16>
    %cst_40 = arith.constant dense<0.000000e+00> : vector<16x16xf32>
    %108 = tpu.matmul %106, %107, %cst_40 {dimension_numbers = #tpu.dot_dimension_numbers<[1], [0], [0], [1], [0, 0, 1, 1], [], []>} : vector<16x16xbf16>, vector<16x16xbf16>, vector<16x16xf32> -> vector<16x16xf32>
    %c288 = arith.constant 288 : index
    %c0_41 = arith.constant 0 : index
    %109 = vector.load %arg2[%c288, %c0_41] : memref<880x128xbf16, #tpu.memory_space<vmem>>, vector<16x32xbf16>
    %110 = arith.truncf %108 : vector<16x16xf32> to vector<16x16xbf16>
    %cst_42 = arith.constant dense<0.000000e+00> : vector<16x32xf32>
    %111 = tpu.matmul %110, %109, %cst_42 {dimension_numbers = #tpu.dot_dimension_numbers<[1], [0], [0], [1], [0, 0, 1, 1], [], []>} : vector<16x16xbf16>, vector<16x32xbf16>, vector<16x32xf32> -> vector<16x32xf32>
    %112 = arith.addf %83, %111 : vector<16x32xf32>
    %113 = arith.addf %16, %112 : vector<16x32xf32>
    %c16 = arith.constant 16 : index
    %c0_43 = arith.constant 0 : index
    %114 = vector.load %arg3[%c16, %c0_43] : memref<136x128xf32, #tpu.memory_space<vmem>>, vector<1x32xf32>
    %115 = vector.broadcast %114 : vector<1x32xf32> to vector<16x32xf32>
    %116 = arith.addf %113, %115 : vector<16x32xf32>
    %cst_44 = arith.constant dense<0.000000e+00> : vector<16xf32>
    %117 = vector.multi_reduction <add>, %116, %cst_44 [1] : vector<16x32xf32> to vector<16xf32>
    %118 = vector.shape_cast %117 : vector<16xf32> to vector<16x1xf32>
    %cst_45 = arith.constant 3.200000e+01 : f32
    %119 = vector.broadcast %cst_45 : f32 to vector<16x1xf32>
    %120 = arith.divf %118, %119 : vector<16x1xf32>
    %121 = vector.broadcast %120 : vector<16x1xf32> to vector<16x32xf32>
    %122 = arith.subf %116, %121 : vector<16x32xf32>
    %123 = arith.mulf %122, %122 : vector<16x32xf32>
    %cst_46 = arith.constant dense<0.000000e+00> : vector<16xf32>
    %124 = vector.multi_reduction <add>, %123, %cst_46 [1] : vector<16x32xf32> to vector<16xf32>
    %125 = vector.shape_cast %124 : vector<16xf32> to vector<16x1xf32>
    %cst_47 = arith.constant 3.200000e+01 : f32
    %126 = vector.broadcast %cst_47 : f32 to vector<16x1xf32>
    %127 = arith.divf %125, %126 : vector<16x1xf32>
    %128 = vector.broadcast %120 : vector<16x1xf32> to vector<16x32xf32>
    %129 = arith.subf %116, %128 : vector<16x32xf32>
    %cst_48 = arith.constant 9.99999974E-6 : f32
    %130 = vector.broadcast %cst_48 : f32 to vector<16x1xf32>
    %131 = arith.addf %127, %130 : vector<16x1xf32>
    %132 = math.rsqrt %131 : vector<16x1xf32>
    %133 = vector.broadcast %132 : vector<16x1xf32> to vector<16x32xf32>
    %134 = arith.mulf %129, %133 : vector<16x32xf32>
    %c24 = arith.constant 24 : index
    %c0_49 = arith.constant 0 : index
    %135 = vector.load %arg3[%c24, %c0_49] : memref<136x128xf32, #tpu.memory_space<vmem>>, vector<1x32xf32>
    %136 = vector.broadcast %135 : vector<1x32xf32> to vector<16x32xf32>
    %137 = arith.mulf %134, %136 : vector<16x32xf32>
    %c32 = arith.constant 32 : index
    %c0_50 = arith.constant 0 : index
    %138 = vector.load %arg3[%c32, %c0_50] : memref<136x128xf32, #tpu.memory_space<vmem>>, vector<1x32xf32>
    %139 = vector.broadcast %138 : vector<1x32xf32> to vector<16x32xf32>
    %140 = arith.addf %137, %139 : vector<16x32xf32>
    %141 = arith.truncf %140 : vector<16x32xf32> to vector<16x32xbf16>
    %c304 = arith.constant 304 : index
    %c0_51 = arith.constant 0 : index
    %142 = vector.load %arg2[%c304, %c0_51] : memref<880x128xbf16, #tpu.memory_space<vmem>>, vector<32x128xbf16>
    %cst_52 = arith.constant dense<0.000000e+00> : vector<16x128xf32>
    %143 = tpu.matmul %141, %142, %cst_52 {dimension_numbers = #tpu.dot_dimension_numbers<[1], [0], [0], [1], [0, 0, 1, 1], [], []>} : vector<16x32xbf16>, vector<32x128xbf16>, vector<16x128xf32> -> vector<16x128xf32>
    %c40 = arith.constant 40 : index
    %c0_53 = arith.constant 0 : index
    %144 = vector.load %arg3[%c40, %c0_53] : memref<136x128xf32, #tpu.memory_space<vmem>>, vector<1x128xf32>
    %145 = vector.broadcast %144 : vector<1x128xf32> to vector<16x128xf32>
    %146 = arith.addf %143, %145 : vector<16x128xf32>
    %cst_54 = arith.constant 0.000000e+00 : f32
    %147 = vector.broadcast %cst_54 : f32 to vector<16x128xf32>
    %148 = arith.maximumf %146, %147 : vector<16x128xf32>
    %149 = arith.truncf %148 : vector<16x128xf32> to vector<16x128xbf16>
    %c336 = arith.constant 336 : index
    %c0_55 = arith.constant 0 : index
    %150 = vector.load %arg2[%c336, %c0_55] : memref<880x128xbf16, #tpu.memory_space<vmem>>, vector<128x32xbf16>
    %cst_56 = arith.constant dense<0.000000e+00> : vector<16x32xf32>
    %151 = tpu.matmul %149, %150, %cst_56 {dimension_numbers = #tpu.dot_dimension_numbers<[1], [0], [0], [1], [0, 0, 1, 1], [], []>} : vector<16x128xbf16>, vector<128x32xbf16>, vector<16x32xf32> -> vector<16x32xf32>
    %152 = arith.addf %116, %151 : vector<16x32xf32>
    %c48 = arith.constant 48 : index
    %c0_57 = arith.constant 0 : index
    %153 = vector.load %arg3[%c48, %c0_57] : memref<136x128xf32, #tpu.memory_space<vmem>>, vector<1x32xf32>
    %154 = vector.broadcast %153 : vector<1x32xf32> to vector<16x32xf32>
    %155 = arith.addf %152, %154 : vector<16x32xf32>
    %cst_58 = arith.constant dense<0.000000e+00> : vector<16xf32>
    %156 = vector.multi_reduction <add>, %155, %cst_58 [1] : vector<16x32xf32> to vector<16xf32>
    %157 = vector.shape_cast %156 : vector<16xf32> to vector<16x1xf32>
    %cst_59 = arith.constant 3.200000e+01 : f32
    %158 = vector.broadcast %cst_59 : f32 to vector<16x1xf32>
    %159 = arith.divf %157, %158 : vector<16x1xf32>
    %160 = vector.broadcast %159 : vector<16x1xf32> to vector<16x32xf32>
    %161 = arith.subf %155, %160 : vector<16x32xf32>
    %162 = arith.mulf %161, %161 : vector<16x32xf32>
    %cst_60 = arith.constant dense<0.000000e+00> : vector<16xf32>
    %163 = vector.multi_reduction <add>, %162, %cst_60 [1] : vector<16x32xf32> to vector<16xf32>
    %164 = vector.shape_cast %163 : vector<16xf32> to vector<16x1xf32>
    %cst_61 = arith.constant 3.200000e+01 : f32
    %165 = vector.broadcast %cst_61 : f32 to vector<16x1xf32>
    %166 = arith.divf %164, %165 : vector<16x1xf32>
    %167 = vector.broadcast %159 : vector<16x1xf32> to vector<16x32xf32>
    %168 = arith.subf %155, %167 : vector<16x32xf32>
    %cst_62 = arith.constant 9.99999974E-6 : f32
    %169 = vector.broadcast %cst_62 : f32 to vector<16x1xf32>
    %170 = arith.addf %166, %169 : vector<16x1xf32>
    %171 = math.rsqrt %170 : vector<16x1xf32>
    %172 = vector.broadcast %171 : vector<16x1xf32> to vector<16x32xf32>
    %173 = arith.mulf %168, %172 : vector<16x32xf32>
    %c56 = arith.constant 56 : index
    %c0_63 = arith.constant 0 : index
    %174 = vector.load %arg3[%c56, %c0_63] : memref<136x128xf32, #tpu.memory_space<vmem>>, vector<1x32xf32>
    %175 = vector.broadcast %174 : vector<1x32xf32> to vector<16x32xf32>
    %176 = arith.mulf %173, %175 : vector<16x32xf32>
    %c64 = arith.constant 64 : index
    %c0_64 = arith.constant 0 : index
    %177 = vector.load %arg3[%c64, %c0_64] : memref<136x128xf32, #tpu.memory_space<vmem>>, vector<1x32xf32>
    %178 = vector.broadcast %177 : vector<1x32xf32> to vector<16x32xf32>
    %179 = arith.addf %176, %178 : vector<16x32xf32>
    %180 = arith.truncf %179 : vector<16x32xf32> to vector<16x32xbf16>
    %c464 = arith.constant 464 : index
    %c0_65 = arith.constant 0 : index
    %181 = vector.load %arg2[%c464, %c0_65] : memref<880x128xbf16, #tpu.memory_space<vmem>>, vector<32x16xbf16>
    %cst_66 = arith.constant dense<0.000000e+00> : vector<16x16xf32>
    %182 = tpu.matmul %180, %181, %cst_66 {dimension_numbers = #tpu.dot_dimension_numbers<[1], [0], [0], [1], [0, 0, 1, 1], [], []>} : vector<16x32xbf16>, vector<32x16xbf16>, vector<16x16xf32> -> vector<16x16xf32>
    %c496 = arith.constant 496 : index
    %c0_67 = arith.constant 0 : index
    %183 = vector.load %arg2[%c496, %c0_67] : memref<880x128xbf16, #tpu.memory_space<vmem>>, vector<32x16xbf16>
    %cst_68 = arith.constant dense<0.000000e+00> : vector<16x16xf32>
    %184 = tpu.matmul %180, %183, %cst_68 {dimension_numbers = #tpu.dot_dimension_numbers<[1], [0], [0], [1], [0, 0, 1, 1], [], []>} : vector<16x32xbf16>, vector<32x16xbf16>, vector<16x16xf32> -> vector<16x16xf32>
    %c528 = arith.constant 528 : index
    %c0_69 = arith.constant 0 : index
    %185 = vector.load %arg2[%c528, %c0_69] : memref<880x128xbf16, #tpu.memory_space<vmem>>, vector<32x16xbf16>
    %cst_70 = arith.constant dense<0.000000e+00> : vector<16x16xf32>
    %186 = tpu.matmul %180, %185, %cst_70 {dimension_numbers = #tpu.dot_dimension_numbers<[1], [0], [0], [1], [0, 0, 1, 1], [], []>} : vector<16x32xbf16>, vector<32x16xbf16>, vector<16x16xf32> -> vector<16x16xf32>
    %187 = arith.truncf %182 : vector<16x16xf32> to vector<16x16xbf16>
    %188 = arith.truncf %184 : vector<16x16xf32> to vector<16x16xbf16>
    %cst_71 = arith.constant dense<0.000000e+00> : vector<16x16xf32>
    %189 = tpu.matmul %187, %188, %cst_71 {dimension_numbers = #tpu.dot_dimension_numbers<[1], [1], [0], [0], [0, 0, 1, 0], [], []>} : vector<16x16xbf16>, vector<16x16xbf16>, vector<16x16xf32> -> vector<16x16xf32>
    %cst_72 = arith.constant 2.500000e-01 : f32
    %190 = vector.broadcast %cst_72 : f32 to vector<16x16xf32>
    %191 = arith.mulf %189, %190 : vector<16x16xf32>
    %192 = arith.addf %191, %30 : vector<16x16xf32>
    %cst_73 = arith.constant dense<0xFF800000> : vector<16xf32>
    %193 = vector.multi_reduction <maximumf>, %192, %cst_73 [1] : vector<16x16xf32> to vector<16xf32>
    %194 = vector.shape_cast %193 : vector<16xf32> to vector<16x1xf32>
    %195 = vector.broadcast %194 : vector<16x1xf32> to vector<16x16xf32>
    %196 = arith.subf %192, %195 : vector<16x16xf32>
    %197 = math.exp %196 : vector<16x16xf32>
    %cst_74 = arith.constant dense<0.000000e+00> : vector<16xf32>
    %198 = vector.multi_reduction <add>, %197, %cst_74 [1] : vector<16x16xf32> to vector<16xf32>
    %199 = vector.shape_cast %198 : vector<16xf32> to vector<16x1xf32>
    %200 = tpu.reciprocal %199 {approx = true} : vector<16x1xf32> -> vector<16x1xf32>
    %201 = vector.broadcast %200 : vector<16x1xf32> to vector<16x16xf32>
    %202 = arith.mulf %197, %201 : vector<16x16xf32>
    %203 = arith.truncf %202 : vector<16x16xf32> to vector<16x16xbf16>
    %204 = arith.truncf %186 : vector<16x16xf32> to vector<16x16xbf16>
    %cst_75 = arith.constant dense<0.000000e+00> : vector<16x16xf32>
    %205 = tpu.matmul %203, %204, %cst_75 {dimension_numbers = #tpu.dot_dimension_numbers<[1], [0], [0], [1], [0, 0, 1, 1], [], []>} : vector<16x16xbf16>, vector<16x16xbf16>, vector<16x16xf32> -> vector<16x16xf32>
    %c656 = arith.constant 656 : index
    %c0_76 = arith.constant 0 : index
    %206 = vector.load %arg2[%c656, %c0_76] : memref<880x128xbf16, #tpu.memory_space<vmem>>, vector<16x32xbf16>
    %207 = arith.truncf %205 : vector<16x16xf32> to vector<16x16xbf16>
    %cst_77 = arith.constant dense<0.000000e+00> : vector<16x32xf32>
    %208 = tpu.matmul %207, %206, %cst_77 {dimension_numbers = #tpu.dot_dimension_numbers<[1], [0], [0], [1], [0, 0, 1, 1], [], []>} : vector<16x16xbf16>, vector<16x32xbf16>, vector<16x32xf32> -> vector<16x32xf32>
    %c560 = arith.constant 560 : index
    %c0_78 = arith.constant 0 : index
    %209 = vector.load %arg2[%c560, %c0_78] : memref<880x128xbf16, #tpu.memory_space<vmem>>, vector<32x16xbf16>
    %cst_79 = arith.constant dense<0.000000e+00> : vector<16x16xf32>
    %210 = tpu.matmul %180, %209, %cst_79 {dimension_numbers = #tpu.dot_dimension_numbers<[1], [0], [0], [1], [0, 0, 1, 1], [], []>} : vector<16x32xbf16>, vector<32x16xbf16>, vector<16x16xf32> -> vector<16x16xf32>
    %c592 = arith.constant 592 : index
    %c0_80 = arith.constant 0 : index
    %211 = vector.load %arg2[%c592, %c0_80] : memref<880x128xbf16, #tpu.memory_space<vmem>>, vector<32x16xbf16>
    %cst_81 = arith.constant dense<0.000000e+00> : vector<16x16xf32>
    %212 = tpu.matmul %180, %211, %cst_81 {dimension_numbers = #tpu.dot_dimension_numbers<[1], [0], [0], [1], [0, 0, 1, 1], [], []>} : vector<16x32xbf16>, vector<32x16xbf16>, vector<16x16xf32> -> vector<16x16xf32>
    %c624 = arith.constant 624 : index
    %c0_82 = arith.constant 0 : index
    %213 = vector.load %arg2[%c624, %c0_82] : memref<880x128xbf16, #tpu.memory_space<vmem>>, vector<32x16xbf16>
    %cst_83 = arith.constant dense<0.000000e+00> : vector<16x16xf32>
    %214 = tpu.matmul %180, %213, %cst_83 {dimension_numbers = #tpu.dot_dimension_numbers<[1], [0], [0], [1], [0, 0, 1, 1], [], []>} : vector<16x32xbf16>, vector<32x16xbf16>, vector<16x16xf32> -> vector<16x16xf32>
    %215 = arith.truncf %210 : vector<16x16xf32> to vector<16x16xbf16>
    %216 = arith.truncf %212 : vector<16x16xf32> to vector<16x16xbf16>
    %cst_84 = arith.constant dense<0.000000e+00> : vector<16x16xf32>
    %217 = tpu.matmul %215, %216, %cst_84 {dimension_numbers = #tpu.dot_dimension_numbers<[1], [1], [0], [0], [0, 0, 1, 0], [], []>} : vector<16x16xbf16>, vector<16x16xbf16>, vector<16x16xf32> -> vector<16x16xf32>
    %cst_85 = arith.constant 2.500000e-01 : f32
    %218 = vector.broadcast %cst_85 : f32 to vector<16x16xf32>
    %219 = arith.mulf %217, %218 : vector<16x16xf32>
    %220 = arith.addf %219, %30 : vector<16x16xf32>
    %cst_86 = arith.constant dense<0xFF800000> : vector<16xf32>
    %221 = vector.multi_reduction <maximumf>, %220, %cst_86 [1] : vector<16x16xf32> to vector<16xf32>
    %222 = vector.shape_cast %221 : vector<16xf32> to vector<16x1xf32>
    %223 = vector.broadcast %222 : vector<16x1xf32> to vector<16x16xf32>
    %224 = arith.subf %220, %223 : vector<16x16xf32>
    %225 = math.exp %224 : vector<16x16xf32>
    %cst_87 = arith.constant dense<0.000000e+00> : vector<16xf32>
    %226 = vector.multi_reduction <add>, %225, %cst_87 [1] : vector<16x16xf32> to vector<16xf32>
    %227 = vector.shape_cast %226 : vector<16xf32> to vector<16x1xf32>
    %228 = tpu.reciprocal %227 {approx = true} : vector<16x1xf32> -> vector<16x1xf32>
    %229 = vector.broadcast %228 : vector<16x1xf32> to vector<16x16xf32>
    %230 = arith.mulf %225, %229 : vector<16x16xf32>
    %231 = arith.truncf %230 : vector<16x16xf32> to vector<16x16xbf16>
    %232 = arith.truncf %214 : vector<16x16xf32> to vector<16x16xbf16>
    %cst_88 = arith.constant dense<0.000000e+00> : vector<16x16xf32>
    %233 = tpu.matmul %231, %232, %cst_88 {dimension_numbers = #tpu.dot_dimension_numbers<[1], [0], [0], [1], [0, 0, 1, 1], [], []>} : vector<16x16xbf16>, vector<16x16xbf16>, vector<16x16xf32> -> vector<16x16xf32>
    %c672 = arith.constant 672 : index
    %c0_89 = arith.constant 0 : index
    %234 = vector.load %arg2[%c672, %c0_89] : memref<880x128xbf16, #tpu.memory_space<vmem>>, vector<16x32xbf16>
    %235 = arith.truncf %233 : vector<16x16xf32> to vector<16x16xbf16>
    %cst_90 = arith.constant dense<0.000000e+00> : vector<16x32xf32>
    %236 = tpu.matmul %235, %234, %cst_90 {dimension_numbers = #tpu.dot_dimension_numbers<[1], [0], [0], [1], [0, 0, 1, 1], [], []>} : vector<16x16xbf16>, vector<16x32xbf16>, vector<16x32xf32> -> vector<16x32xf32>
    %237 = arith.addf %208, %236 : vector<16x32xf32>
    %238 = arith.addf %155, %237 : vector<16x32xf32>
    %c72 = arith.constant 72 : index
    %c0_91 = arith.constant 0 : index
    %239 = vector.load %arg3[%c72, %c0_91] : memref<136x128xf32, #tpu.memory_space<vmem>>, vector<1x32xf32>
    %240 = vector.broadcast %239 : vector<1x32xf32> to vector<16x32xf32>
    %241 = arith.addf %238, %240 : vector<16x32xf32>
    %cst_92 = arith.constant dense<0.000000e+00> : vector<16xf32>
    %242 = vector.multi_reduction <add>, %241, %cst_92 [1] : vector<16x32xf32> to vector<16xf32>
    %243 = vector.shape_cast %242 : vector<16xf32> to vector<16x1xf32>
    %cst_93 = arith.constant 3.200000e+01 : f32
    %244 = vector.broadcast %cst_93 : f32 to vector<16x1xf32>
    %245 = arith.divf %243, %244 : vector<16x1xf32>
    %246 = vector.broadcast %245 : vector<16x1xf32> to vector<16x32xf32>
    %247 = arith.subf %241, %246 : vector<16x32xf32>
    %248 = arith.mulf %247, %247 : vector<16x32xf32>
    %cst_94 = arith.constant dense<0.000000e+00> : vector<16xf32>
    %249 = vector.multi_reduction <add>, %248, %cst_94 [1] : vector<16x32xf32> to vector<16xf32>
    %250 = vector.shape_cast %249 : vector<16xf32> to vector<16x1xf32>
    %cst_95 = arith.constant 3.200000e+01 : f32
    %251 = vector.broadcast %cst_95 : f32 to vector<16x1xf32>
    %252 = arith.divf %250, %251 : vector<16x1xf32>
    %253 = vector.broadcast %245 : vector<16x1xf32> to vector<16x32xf32>
    %254 = arith.subf %241, %253 : vector<16x32xf32>
    %cst_96 = arith.constant 9.99999974E-6 : f32
    %255 = vector.broadcast %cst_96 : f32 to vector<16x1xf32>
    %256 = arith.addf %252, %255 : vector<16x1xf32>
    %257 = math.rsqrt %256 : vector<16x1xf32>
    %258 = vector.broadcast %257 : vector<16x1xf32> to vector<16x32xf32>
    %259 = arith.mulf %254, %258 : vector<16x32xf32>
    %c80_97 = arith.constant 80 : index
    %c0_98 = arith.constant 0 : index
    %260 = vector.load %arg3[%c80_97, %c0_98] : memref<136x128xf32, #tpu.memory_space<vmem>>, vector<1x32xf32>
    %261 = vector.broadcast %260 : vector<1x32xf32> to vector<16x32xf32>
    %262 = arith.mulf %259, %261 : vector<16x32xf32>
    %c88 = arith.constant 88 : index
    %c0_99 = arith.constant 0 : index
    %263 = vector.load %arg3[%c88, %c0_99] : memref<136x128xf32, #tpu.memory_space<vmem>>, vector<1x32xf32>
    %264 = vector.broadcast %263 : vector<1x32xf32> to vector<16x32xf32>
    %265 = arith.addf %262, %264 : vector<16x32xf32>
    %266 = arith.truncf %265 : vector<16x32xf32> to vector<16x32xbf16>
    %c688 = arith.constant 688 : index
    %c0_100 = arith.constant 0 : index
    %267 = vector.load %arg2[%c688, %c0_100] : memref<880x128xbf16, #tpu.memory_space<vmem>>, vector<32x128xbf16>
    %cst_101 = arith.constant dense<0.000000e+00> : vector<16x128xf32>
    %268 = tpu.matmul %266, %267, %cst_101 {dimension_numbers = #tpu.dot_dimension_numbers<[1], [0], [0], [1], [0, 0, 1, 1], [], []>} : vector<16x32xbf16>, vector<32x128xbf16>, vector<16x128xf32> -> vector<16x128xf32>
    %c96 = arith.constant 96 : index
    %c0_102 = arith.constant 0 : index
    %269 = vector.load %arg3[%c96, %c0_102] : memref<136x128xf32, #tpu.memory_space<vmem>>, vector<1x128xf32>
    %270 = vector.broadcast %269 : vector<1x128xf32> to vector<16x128xf32>
    %271 = arith.addf %268, %270 : vector<16x128xf32>
    %cst_103 = arith.constant 0.000000e+00 : f32
    %272 = vector.broadcast %cst_103 : f32 to vector<16x128xf32>
    %273 = arith.maximumf %271, %272 : vector<16x128xf32>
    %274 = arith.truncf %273 : vector<16x128xf32> to vector<16x128xbf16>
    %c720 = arith.constant 720 : index
    %c0_104 = arith.constant 0 : index
    %275 = vector.load %arg2[%c720, %c0_104] : memref<880x128xbf16, #tpu.memory_space<vmem>>, vector<128x32xbf16>
    %cst_105 = arith.constant dense<0.000000e+00> : vector<16x32xf32>
    %276 = tpu.matmul %274, %275, %cst_105 {dimension_numbers = #tpu.dot_dimension_numbers<[1], [0], [0], [1], [0, 0, 1, 1], [], []>} : vector<16x128xbf16>, vector<128x32xbf16>, vector<16x32xf32> -> vector<16x32xf32>
    %277 = arith.addf %241, %276 : vector<16x32xf32>
    %c104 = arith.constant 104 : index
    %c0_106 = arith.constant 0 : index
    %278 = vector.load %arg3[%c104, %c0_106] : memref<136x128xf32, #tpu.memory_space<vmem>>, vector<1x32xf32>
    %279 = vector.broadcast %278 : vector<1x32xf32> to vector<16x32xf32>
    %280 = arith.addf %277, %279 : vector<16x32xf32>
    %cst_107 = arith.constant dense<0.000000e+00> : vector<16xf32>
    %281 = vector.multi_reduction <add>, %280, %cst_107 [1] : vector<16x32xf32> to vector<16xf32>
    %282 = vector.shape_cast %281 : vector<16xf32> to vector<16x1xf32>
    %cst_108 = arith.constant 3.200000e+01 : f32
    %283 = vector.broadcast %cst_108 : f32 to vector<16x1xf32>
    %284 = arith.divf %282, %283 : vector<16x1xf32>
    %285 = vector.broadcast %284 : vector<16x1xf32> to vector<16x32xf32>
    %286 = arith.subf %280, %285 : vector<16x32xf32>
    %287 = arith.mulf %286, %286 : vector<16x32xf32>
    %cst_109 = arith.constant dense<0.000000e+00> : vector<16xf32>
    %288 = vector.multi_reduction <add>, %287, %cst_109 [1] : vector<16x32xf32> to vector<16xf32>
    %289 = vector.shape_cast %288 : vector<16xf32> to vector<16x1xf32>
    %cst_110 = arith.constant 3.200000e+01 : f32
    %290 = vector.broadcast %cst_110 : f32 to vector<16x1xf32>
    %291 = arith.divf %289, %290 : vector<16x1xf32>
    %292 = vector.broadcast %284 : vector<16x1xf32> to vector<16x32xf32>
    %293 = arith.subf %280, %292 : vector<16x32xf32>
    %cst_111 = arith.constant 9.99999974E-6 : f32
    %294 = vector.broadcast %cst_111 : f32 to vector<16x1xf32>
    %295 = arith.addf %291, %294 : vector<16x1xf32>
    %296 = math.rsqrt %295 : vector<16x1xf32>
    %297 = vector.broadcast %296 : vector<16x1xf32> to vector<16x32xf32>
    %298 = arith.mulf %293, %297 : vector<16x32xf32>
    %c112_112 = arith.constant 112 : index
    %c0_113 = arith.constant 0 : index
    %299 = vector.load %arg3[%c112_112, %c0_113] : memref<136x128xf32, #tpu.memory_space<vmem>>, vector<1x32xf32>
    %300 = vector.broadcast %299 : vector<1x32xf32> to vector<16x32xf32>
    %301 = arith.mulf %298, %300 : vector<16x32xf32>
    %c120 = arith.constant 120 : index
    %c0_114 = arith.constant 0 : index
    %302 = vector.load %arg3[%c120, %c0_114] : memref<136x128xf32, #tpu.memory_space<vmem>>, vector<1x32xf32>
    %303 = vector.broadcast %302 : vector<1x32xf32> to vector<16x32xf32>
    %304 = arith.addf %301, %303 : vector<16x32xf32>
    %305 = arith.truncf %304 : vector<16x32xf32> to vector<16x32xbf16>
    %c848 = arith.constant 848 : index
    %c0_115 = arith.constant 0 : index
    %306 = vector.load %arg2[%c848, %c0_115] : memref<880x128xbf16, #tpu.memory_space<vmem>>, vector<32x128xbf16>
    %cst_116 = arith.constant dense<0.000000e+00> : vector<16x128xf32>
    %307 = tpu.matmul %305, %306, %cst_116 {dimension_numbers = #tpu.dot_dimension_numbers<[1], [0], [0], [1], [0, 0, 1, 1], [], []>} : vector<16x32xbf16>, vector<32x128xbf16>, vector<16x128xf32> -> vector<16x128xf32>
    %c128 = arith.constant 128 : index
    %c0_117 = arith.constant 0 : index
    %308 = vector.load %arg3[%c128, %c0_117] : memref<136x128xf32, #tpu.memory_space<vmem>>, vector<1x128xf32>
    %309 = vector.broadcast %308 : vector<1x128xf32> to vector<16x128xf32>
    %310 = arith.addf %307, %309 : vector<16x128xf32>
    %c0_118 = arith.constant 0 : index
    %c0_119 = arith.constant 0 : index
    %311 = vector.load %arg4[%c0_118, %c0_119] : memref<16x128xf32, #tpu.memory_space<vmem>>, vector<16x128xf32>
    tpu.vector_store %arg4[%c0_118, %c0_119], %310 {strides = array<i32>} : memref<16x128xf32, #tpu.memory_space<vmem>>, vector<16x128xf32>,
    %312 = vector.extract_strided_slice %310 {offsets = [0, 0], sizes = [16, 64], strides = [1, 1]} : vector<16x128xf32> to vector<16x64xf32>
    %cst_120 = arith.constant dense<0xFF800000> : vector<16xf32>
    %313 = vector.multi_reduction <maximumf>, %312, %cst_120 [1] : vector<16x64xf32> to vector<16xf32>
    %314 = vector.shape_cast %313 : vector<16xf32> to vector<16x1xf32>
    %315 = vector.broadcast %314 : vector<16x1xf32> to vector<16x64xf32>
    %316 = arith.subf %312, %315 : vector<16x64xf32>
    %317 = math.exp %316 : vector<16x64xf32>
    %cst_121 = arith.constant dense<0.000000e+00> : vector<16xf32>
    %318 = vector.multi_reduction <add>, %317, %cst_121 [1] : vector<16x64xf32> to vector<16xf32>
    %319 = vector.shape_cast %318 : vector<16xf32> to vector<16x1xf32>
    %320 = math.log %319 : vector<16x1xf32>
    %321 = arith.addf %314, %320 : vector<16x1xf32>
    %322 = tpu.iota {dimensions = array<i32: 1>} : vector<16x64xi32>
    %c0_122 = arith.constant 0 : index
    %c0_123 = arith.constant 0 : index
    %323 = vector.load %arg1[%c0_122, %c0_123] : memref<16x1xi32, #tpu.memory_space<vmem>>, vector<16x1xi32>
    %324 = vector.broadcast %323 : vector<16x1xi32> to vector<16x64xi32>
    %325 = arith.cmpi eq, %322, %324 : vector<16x64xi32>
    %cst_124 = arith.constant 1.000000e+00 : f32
    %cst_125 = arith.constant 0.000000e+00 : f32
    %326 = vector.broadcast %cst_124 : f32 to vector<16x64xf32>
    %327 = vector.broadcast %cst_125 : f32 to vector<16x64xf32>
    %328 = arith.select %325, %326, %327 : vector<16x64xi1>, vector<16x64xf32>
    %329 = arith.mulf %312, %328 : vector<16x64xf32>
    %cst_126 = arith.constant dense<0.000000e+00> : vector<16xf32>
    %330 = vector.multi_reduction <add>, %329, %cst_126 [1] : vector<16x64xf32> to vector<16xf32>
    %331 = vector.shape_cast %330 : vector<16xf32> to vector<16x1xf32>
    %332 = arith.subf %321, %331 : vector<16x1xf32>
    %cst_127 = arith.constant dense<0.000000e+00> : vector<1xf32>
    %333 = vector.multi_reduction <add>, %332, %cst_127 [0] : vector<16x1xf32> to vector<1xf32>
    %334 = vector.shape_cast %333 : vector<1xf32> to vector<1x1xf32>
    %cst_128 = arith.constant 6.250000e-02 : f32
    %335 = vector.broadcast %cst_128 : f32 to vector<1x1xf32>
    %336 = arith.mulf %334, %335 : vector<1x1xf32>
    %c0_129 = arith.constant 0 : index
    %c0_130 = arith.constant 0 : index
    %337 = vector.load %arg5[%c0_129, %c0_130] : memref<1x1xf32, #tpu.memory_space<vmem>>, vector<1x1xf32>
    tpu.vector_store %arg5[%c0_129, %c0_130], %336 {strides = array<i32>} : memref<1x1xf32, #tpu.memory_space<vmem>>, vector<1x1xf32>,
    return
  }
}

</mosaic_0001>

<bundles_post_ra>
// kernel: gpt_forward.1
= control target key start
LH: loop header
LB: loop body
LE: loop exit
PB: predicated region body
PF: predicated region fallthrough
CT: control target
= control target key end

     0   :  { %11 = vsyncpa [#allocation3], 0  ;;  %s3325_s0 = inlined_call_operand.vmem [shape: s32[16,1], index: 0, kind: input, shape index: {}]   ;;  %s3326_s1 = inlined_call_operand.vmem [shape: s32[16,1], index: 1, kind: input, shape index: {}]   ;;  %s3327_s2 = inlined_call_operand.hbm [shape: bf16[880,128], index: 2, kind: input, shape index: {}]   ;;  %s3328_s3 = inlined_call_operand.hbm [shape: f32[136,128], index: 3, kind: input, shape index: {}]   ;;  %s3329_s4 = inlined_call_operand.vmem [shape: f32[16,128], index: 4, kind: output, shape index: {0}]   ;;  %s3330_s5 = inlined_call_operand.hbm [shape: f32[1,1], index: 5, kind: output, shape index: {1}]  }
   0x1   :  { %12 = vsyncpa [#allocation6], 0 }
   0x2   :  { %13 = vsyncpa [#allocation4], 0  ;;  %s2931_s18 = smov [#allocation2]   ;;  %s2859_s22 = scalar_lea.hbm %s3327_s2, 7040 }
   0x3   :  { %s23_s19 = sshll.u32 %s2931_s18, 4  ;;  %p2860_p0 = scmp.ne.s32.totalorder %s3327_s2, %s2859_s22  ;;  %s24_s19 = int_to_ptr.vmem [resolvable:$true] %s23_s19 }
   0x4   :  { %p2863_p1 = scmp.lt.u32.totalorder %s2859_s22, %s3327_s2 }
   0x6   :  { %p2865_p2 = pnand %p2863_p1, %p2860_p0 }
   0x8   :  { %2868 = shalt.err (!%p2865_p2)
}
   0x9   :  { %s2869_s27 = scalar_lea.vmem %s24_s19, 7040  ;;  %p2874_p4 = scmp.lt.s32.totalorder %s24_s19, %s24_s19 }
   0xa   :  { %p2870_p3 = scmp.ne.s32.totalorder %s24_s19, %s2869_s27  ;;  %p2875_p5 = scmp.lt.s32.totalorder %s2869_s27, %s2869_s27 }
   0xc   :  { %p2876_p6 = por %p2875_p5, %p2874_p4 }
   0xe   :  { %p2877_p7 = pnand %p2876_p6, %p2870_p3 }
  0x10   :  { %2880 = shalt.err (!%p2877_p7)
}
  0x11   :  { %s2932_s28 = smov 64   ;;  %s2933_s29 = smov 4  }
  0x12   :  { %29 = dma.hbm_to_vmem [thread:$0]  %s3327_s2, 7040, %s24_s19, [#allocation3], %s2932_s28, %s2932_s28, %s2933_s29  }
  0x13   :  { %s2934_s7 = smov [#allocation5]   ;;  %s2881_s11 = scalar_lea.hbm %s3328_s3, 2176 }
  0x14   :  { %s35_s8 = sshll.u32 %s2934_s7, 4  ;;  %p2882_p8 = scmp.ne.s32.totalorder %s3328_s3, %s2881_s11  ;;  %s36_s8 = int_to_ptr.vmem [resolvable:$true] %s35_s8 }
  0x15   :  { %p2885_p9 = scmp.lt.u32.totalorder %s2881_s11, %s3328_s3 }
  0x17   :  { %p2887_p10 = pnand %p2885_p9, %p2882_p8 }
  0x19   :  { %2890 = shalt.err (!%p2887_p10)
}
  0x1a   :  { %s2891_s16 = scalar_lea.vmem %s36_s8, 2176  ;;  %p2896_p12 = scmp.lt.s32.totalorder %s36_s8, %s36_s8 }
  0x1b   :  { %p2892_p11 = scmp.ne.s32.totalorder %s36_s8, %s2891_s16  ;;  %p2897_p13 = scmp.lt.s32.totalorder %s2891_s16, %s2891_s16 }
  0x1d   :  { %p2898_p0 = por %p2897_p13, %p2896_p12 }
  0x1f   :  { %p2899_p1 = pnand %p2898_p0, %p2892_p11 }
  0x21   :  { %2902 = shalt.err (!%p2899_p1)
}
  0x22   :  { %s2935_s2 = smov 128   ;;  %s2936_s17 = smov 8  }
  0x23   :  { %41 = dma.hbm_to_vmem [thread:$0]  %s3328_s3, 2176, %s36_s8, [#allocation6], %s2935_s2, %s2935_s2, %s2936_s17  }
  0x24   :  { %2925 = dma.done.wait [#allocation3], 7040  }
  0x25   :  { %2926 = vsyncadd [#allocation3], 4294960256 }
  0x26   :  { %2927 = dma.done.wait [#allocation6], 2176  }
  0x27   :  { %2928 = vsyncadd [#allocation6], 4294965120  ;;  %v2937_v0 = vmov 0   ;;  %v2938_v1 = vmov 0.0   ;;  %v49_v2 = vld [vmem:[%s3325_s0] sm:$0xff]  ;;  %v50_v4 = vld [vmem:[%s3325_s0 + $0x8] sm:$0xff]  ;;  %v51_v9 = vlaneseq }
  0x28   :  { %2742 = vset.pattern.permute.xlu0 %v2937_v0  ;;  %2485 = vmatprep.subr.bf16.mxu0 %v2938_v1  ;;  %v2744_v3 = vld [vmem:[#allocation2] sm:$0xff]   ;;  %v2745_v5 = vld [vmem:[#allocation2 + $0x8] sm:$0xff]   ;;  %v2746_v6 = vld [vmem:[#allocation2 + $0x10] sm:$0xff]   ;;  %vm2939_vm0 = vmmov 0   ;;  %vm115_vm7 = vcmask 654336   ;;  %vm172_vm8 = vcmask 261120  }
  0x29   :  { %2507 = vmatprep.subr.bf16.mxu1 %v2938_v1  ;;  %2743 = vset.pattern.permute.xlu1 %v2937_v0  ;;  %v2747_v7 = vld [vmem:[#allocation2 + $0x18] sm:$0xff]   ;;  %v2748_v8 = vld [vmem:[#allocation2 + $0x20] sm:$0xff]   ;;  %v3013_v10 = vshrl.u32 %v51_v9, 7  ;;  %v3020_v14 = vand.u32 127, %v51_v9  ;;  %v2749_v38 = vld [vmem:[#allocation2 + $0x28] sm:$0xff]   ;;  %vm391_vm9 = vcmask 130048  }
  0x2a   :  { %57 = vperm.xlu0 %2742, %v49_v2   ;;  %2486 = vmatpush3.bf16.msra.mxu0 %v2744_v3  ;;  %v2750_v39 = vld [vmem:[#allocation2 + $0x38] sm:$0xff]   ;;  %v2751_v40 = vld [vmem:[#allocation2 + $0x30] sm:$0xff]   ;;  %v2752_v41 = vld [vmem:[#allocation2 + $0x40] sm:$0xff]  }
  0x2b   :  { %2487 = vmatprep.subr.bf16.mxu0 %v2938_v1  ;;  %2495 = vmatprep.mubr.msk.bf16.mxu0 %vm2939_vm0, %v2938_v1  ;;  %v3016_v11 = vadd.s32 8, %v3013_v10  ;;  %v64_v12 = vand.u32 7, %v3013_v10  ;;  %v2298_v50 = vld [vmem:[#allocation5] ss:$0 sm:$0xff]  ;;  %v2299_v54 = vld [vmem:[#allocation5 + $0x8] ss:$0 sm:$0xff]  ;;  %vm166_vm11 = vcmp.ge.s32.totalorder %v3013_v10, %v3020_v14 }
  0x2c   :  { %2511 = vmatprep.mubr.msk.bf16.mxu1 %vm2939_vm0, %v2938_v1  ;;  %2508 = vmatpush3.bf16.msra.mxu1 %v2750_v39  ;;  %v2753_v58 = vld [vmem:[#allocation2 + $0x48] sm:$0xff]   ;;  %v2754_v60 = vld [vmem:[#allocation2 + $0x50] sm:$0xff]  }
  0x2d   :  { %v65_v13 = vand.u32 7, %v3016_v11  ;;  %v66_v15 = vadd.s32 64, %v64_v12  ;;  %2509 = vmatprep.subr.bf16.mxu1 %v2938_v1  ;;  %vm167_vm13 = vcmp.ge.s32.totalorder %v3016_v11, %v3020_v14 }
  0x2e   :  { %60 = vperm.xlu0 %2742, %v50_v4   ;;  %2488 = vmatpush3.bf16.msra.mxu0 %v2745_v5 }
  0x2f   :  { %2489 = vmatprep.subr.bf16.mxu0 %v2938_v1  ;;  %v67_v16 = vadd.s32 64, %v65_v13  ;;  %vm68_vm1 = vcmp.eq.s32.totalorder %v3020_v14, %v66_v15 }
  0x30   :  { %2510 = vmatpush3.bf16.msra.mxu1 %v2752_v41 }
  0x31   :  { %vm69_vm3 = vcmp.eq.s32.totalorder %v3020_v14, %v67_v16  ;;  %2515 = vmatprep.subr.bf16.mxu1 %v2938_v1 }
  0x32   :  { %2490 = vmatpush3.bf16.msra.mxu0 %v2746_v6 }
  0x33   :  { %2491 = vmatprep.subr.bf16.mxu0 %v2938_v1 }
  0x36   :  { %2492 = vmatpush3.bf16.msra.mxu0 %v2747_v7 }
  0x37   :  { %2493 = vmatprep.subr.bf16.mxu0 %v2938_v1 }
  0x3a   :  { %2494 = vmatpush3.bf16.msra.mxu0 %v2748_v8 }
  0x3b   :  { %2499 = vmatprep.subr.bf16.mxu0 %v2938_v1 }
  0xa9   :  { %v58_v17 = vpop.permute.xlu0 %57 }
  0xaa   :  { %vm62_vm2 = vcmp.eq.s32.totalorder %v3020_v14, %v58_v17  ;;  %v2755_v17 = vld [vmem:[#allocation2 + $0x58] sm:$0xff]  }
  0xab   :  { %vm70_vm4 = vmor %vm62_vm2, %vm68_vm1 }
  0xac   :  { %v72_v19 = vsel %vm70_vm4, 1.0, %v2938_v1 }
  0xad   :  { %v61_v18 = vpop.permute.xlu0 %60 }
  0xae   :  { %vm63_vm5 = vcmp.eq.s32.totalorder %v3020_v14, %v61_v18 }
  0xaf   :  { %vm71_vm6 = vmor %vm63_vm5, %vm69_vm3  ;;  %vm2270_vm3 = vcmask 0  }
  0xb0   :  { %v73_v20 = vsel %vm71_vm6, 1.0, %v2938_v1 }
  0xb1   :  { %v74_v21 = vpack.c.bf16 %v73_v20, %v72_v19  ;;  %v2756_v20 = vld [vmem:[#allocation2 + $0x60] sm:$0xff]  }
  0xb3   :  { %2496 = vmatmul.mubr.msk.bf16.vlgmr.msra.gmra.mrb[0].mxu0 %vm115_vm7, %v74_v21  ;;  %v2757_v21 = vld [vmem:[#allocation2 + $0x78] sm:$0xff]  }
  0xb4   :  { %2503 = vmatprep.mubr.msk.bf16.mxu0 %vm2939_vm0, %v2938_v1  ;;  %2500 = vmatpush3.bf16.msra.mxu0 %v2749_v38 }
  0xb5   :  { %2501 = vmatprep.subr.bf16.mxu0 %v2938_v1 }
  0xb8   :  { %2502 = vmatpush3.bf16.msra.mxu0 %v2751_v40 }
  0xb9   :  { %2523 = vmatprep.subr.bf16.mxu0 %v2938_v1 }
 0x186   :  { %v3034_v22 = vpop.f32.mrb[0].mxu0 }
 0x187   :  { %v2497_v23 = vpop.f32.mrb[1].mxu0  ;;  %v173_v24 = vsel %vm172_vm8, %v3034_v22, 0.0 }
 0x188   :  { %174 = vadd.xlane.f32.xlu1 %v173_v24  ;;  %v3038_v25 = vpop.f32.mrb[2].mxu0  ;;  %v2758_v23 = vld [vmem:[#allocation2 + $0x80] sm:$0xff]   ;;  %v162_v24 = vand.u32 7, %v3020_v14 }
 0x189   :  { %v2498_v26 = vpop.f32.mrb[3].mxu0  ;;  %v176_v27 = vsel %vm172_vm8, %v3038_v25, 0.0 }
 0x18a   :  { %v160_v26 = vsub.s32 %v3013_v10, %v64_v12 }
 0x18c   :  { %177 = vadd.xlane.f32.xlu1 %v176_v27  ;;  %v163_v27 = vsub.s32 %v3020_v14, %v162_v24 }
 0x18e   :  { %vm164_vm10 = vcmp.eq.s32.totalorder %v160_v26, %v163_v27 }
 0x18f   :  { %vm168_vm14 = vmand %vm164_vm10, %vm166_vm11 }
 0x215   :  { %v175_v28 = vpop.xlane.xlu1 %174 }
 0x216   :  { %v180_v29 = vmul.f32 0.03125, %v175_v28  ;;  %v161_v28 = vsub.s32 %v3016_v11, %v65_v13 }
 0x218   :  { %v182_v30 = vsub.f32 %v3034_v22, %v180_v29  ;;  %vm165_vm12 = vcmp.eq.s32.totalorder %v161_v28, %v163_v27 }
 0x219   :  { %v178_v31 = vpop.xlane.xlu1 %177  ;;  %vm169_vm15 = vmand %vm165_vm12, %vm167_vm13 }
 0x21a   :  { %v181_v32 = vmul.f32 0.03125, %v178_v31  ;;  %v184_v33 = vmul.f32 %v182_v30, %v182_v30 }
 0x21c   :  { %v183_v34 = vsub.f32 %v3038_v25, %v181_v32  ;;  %v186_v35 = vsel %vm172_vm8, %v184_v33, 0.0 }
 0x21d   :  { %187 = vadd.xlane.f32.xlu0 %v186_v35 }
 0x21e   :  { %v185_v36 = vmul.f32 %v183_v34, %v183_v34 }
 0x220   :  { %v189_v37 = vsel %vm172_vm8, %v185_v36, 0.0 }
 0x221   :  { %190 = vadd.xlane.f32.xlu1 %v189_v37 }
 0x2aa   :  { %v188_v42 = vpop.xlane.xlu0 %187 }
 0x2ab   :  { %v192_v43 = vmul.f32 0.03125, %v188_v42 }
 0x2ad   :  { %v194_v44 = vadd.f32 1e-05, %v192_v43 }
 0x2ae   :  { %v191_v45 = vpop.xlane.xlu1 %190 }
 0x2af   :  { %2799 = vrsqrt.f32 %v194_v44  ;;  %v193_v46 = vmul.f32 0.03125, %v191_v45 }
 0x2b1   :  { %v195_v47 = vadd.f32 1e-05, %v193_v46 }
 0x2b3   :  { %2801 = vrsqrt.f32 %v195_v47 }
 0x2b9   :  { %v2800_v48 = vpop.eup %2799 }
 0x2ba   :  { %v198_v49 = vmul.f32 %v2800_v48, %v182_v30  ;;  %v2940_v30 = vmov -1e+30  }
 0x2bb   :  { %v3096_v31 = vsel %vm168_vm14, 0.0, %v2940_v30 }
 0x2bc   :  { %v205_v52 = vmul.f32 %v2298_v50, %v198_v49 }
 0x2bd   :  { %v2802_v51 = vpop.eup %2801 }
 0x2be   :  { %v199_v53 = vmul.f32 %v2802_v51, %v183_v34  ;;  %v212_v56 = vadd.f32 %v2299_v54, %v205_v52  ;;  %v3098_v34 = vsel %vm169_vm15, 0.0, %v2940_v30 }
 0x2c0   :  { %v206_v55 = vmul.f32 %v2298_v50, %v199_v53 }
 0x2c2   :  { %v213_v57 = vadd.f32 %v2299_v54, %v206_v55 }
 0x2c4   :  { %v3050_v59 = vpack.c.bf16 %v213_v57, %v212_v56 }
 0x2c6   :  { %2504 = vmatmul.mubr.msk.bf16.vlgmr.msra.gmra.mrb[4].mxu0 %vm172_vm8, %v3050_v59  ;;  %2512 = vmatmul.mubr.msk.bf16.vlgmr.msra.gmra.mrb[0].mxu1 %vm172_vm8, %v3050_v59 }
 0x2c7   :  { %2516 = vmatpush3.bf16.msra.mxu1 %v2753_v58  ;;  %2519 = vmatprep.mubr.msk.bf16.mxu1 %vm2939_vm0, %v2938_v1 }
 0x2c8   :  { %2517 = vmatprep.subr.bf16.mxu1 %v2938_v1  ;;  %2525 = vmatprep.mubr.msk.bf16.mxu0 %vm2939_vm0, %v2938_v1 }
 0x2cb   :  { %2518 = vmatpush3.bf16.msra.mxu1 %v2754_v60 }
 0x2cc   :  { %2529 = vmatprep.subr.bf16.mxu1 %v2938_v1 }
 0x2ce   :  { %2520 = vmatmul.mubr.msk.bf16.vlgmr.msra.gmra.mrb[4].mxu1 %vm172_vm8, %v3050_v59 }
 0x2cf   :  { %2531 = vmatprep.mubr.msk.bf16.mxu1 %vm2939_vm0, %v2938_v1 }
 0x399   :  { %v268_v61 = vpop.f32.mrb[4].mxu0  ;;  %v325_v62 = vpop.f32.mrb[0].mxu1 }
 0x39a   :  { %v2505_v63 = vpop.f32.mrb[5].mxu0  ;;  %v2513_v0 = vpop.f32.mrb[1].mxu1 }
 0x39b   :  { %v271_v2 = vpop.f32.mrb[6].mxu0  ;;  %v328_v3 = vpop.f32.mrb[2].mxu1 }
 0x39c   :  { %v389_v4 = vpack.c.bf16 %v271_v2, %v268_v61  ;;  %v390_v5 = vpack.c.bf16 %v328_v3, %v325_v62  ;;  %v2506_v6 = vpop.f32.mrb[7].mxu0  ;;  %v2514_v7 = vpop.f32.mrb[3].mxu1  ;;  %v2759_v2 = vld [vmem:[#allocation2 + $0x68] sm:$0xff]  }
 0x39e   :  { %v396_v8 = vsel %vm391_vm9, %v390_v5, 0 }
 0x39f   :  { %2524 = vmatpush3.bf16.xpose.msra.mxu0 %v396_v8 }
 0x3a0   :  { %2535 = vmatprep.subr.bf16.mxu0 %v2938_v1 }
 0x3a1   :  { %v382_v9 = vpop.f32.mrb[4].mxu1 }
 0x3a2   :  { %v2521_v15 = vpop.f32.mrb[5].mxu1 }
 0x3a3   :  { %v385_v16 = vpop.f32.mrb[6].mxu1 }
 0x3a4   :  { %v466_v18 = vpack.c.bf16 %v385_v16, %v382_v9  ;;  %v2522_v19 = vpop.f32.mrb[7].mxu1 }
 0x3a6   :  { %2526 = vmatmul.mubr.msk.bf16.vlgmr.msra.gmra.mrb[8].mxu0 %vm391_vm9, %v389_v4  ;;  %2530 = vmatpush3.bf16.msra.mxu1 %v466_v18  ;;  %v2760_v4 = vld [vmem:[#allocation2 + $0x70] sm:$0xff]  }
 0x3a7   :  { %2536 = vmatpush3.bf16.msra.mxu0 %v2755_v17  ;;  %2539 = vmatprep.mubr.msk.bf16.mxu0 %vm2939_vm0, %v2938_v1 }
 0x3a8   :  { %2537 = vmatprep.subr.bf16.mxu0 %v2938_v1  ;;  %2543 = vmatprep.subr.bf16.mxu1 %v2938_v1 }
 0x3ab   :  { %2538 = vmatpush3.bf16.msra.mxu0 %v2756_v20 }
 0x3ac   :  { %2551 = vmatprep.subr.bf16.mxu0 %v2938_v1 }
 0x3ae   :  { %2540 = vmatmul.mubr.msk.bf16.vlgmr.msra.gmra.mrb[12].mxu0 %vm172_vm8, %v3050_v59 }
 0x3af   :  { %2552 = vmatpush3.bf16.msra.mxu0 %v2757_v21  ;;  %2555 = vmatprep.mubr.msk.bf16.mxu0 %vm2939_vm0, %v2938_v1 }
 0x3b0   :  { %2553 = vmatprep.subr.bf16.mxu0 %v2938_v1 }
 0x3b3   :  { %2554 = vmatpush3.bf16.msra.mxu0 %v2758_v23 }
 0x3b4   :  { %2565 = vmatprep.subr.bf16.mxu0 %v2938_v1 }
 0x3b6   :  { %2556 = vmatmul.mubr.msk.bf16.vlgmr.msra.gmra.mrb[16].mxu0 %vm172_vm8, %v3050_v59 }
 0x3b7   :  { %2567 = vmatprep.mubr.msk.bf16.mxu0 %vm2939_vm0, %v2938_v1 }
 0x479   :  { %v432_v29 = vpop.f32.mrb[8].mxu0 }
 0x47a   :  { %v439_v12 = vmul.f32 0.25, %v432_v29  ;;  %v2527_v32 = vpop.f32.mrb[9].mxu0 }
 0x47b   :  { %v435_v33 = vpop.f32.mrb[10].mxu0 }
 0x47c   :  { %v440_v13 = vmul.f32 0.25, %v435_v33  ;;  %v2528_v35 = vpop.f32.mrb[11].mxu0  ;;  %v441_v36 = vadd.f32 %v439_v12, %v3096_v31 }
 0x47e   :  { %v443_v10 = vsel %vm391_vm9, %v441_v36, -inf  ;;  %v442_v37 = vadd.f32 %v440_v13, %v3098_v34 }
 0x47f   :  { %444 = vmax.xlane.f32.xlu1 %v443_v10 }
 0x480   :  { %v446_v39 = vsel %vm391_vm9, %v442_v37, -inf }
 0x481   :  { %v564_v11 = vpop.f32.mrb[12].mxu0 }
 0x482   :  { %v2541_v38 = vpop.f32.mrb[13].mxu0 }
 0x483   :  { %447 = vmax.xlane.f32.xlu1 %v446_v39  ;;  %v567_v40 = vpop.f32.mrb[14].mxu0 }
 0x484   :  { %v685_v41 = vpack.c.bf16 %v567_v40, %v564_v11  ;;  %v2542_v42 = vpop.f32.mrb[15].mxu0  ;;  %v2762_v40 = vld [vmem:[#allocation2 + $0x90] sm:$0xff]  }
 0x489   :  { %v678_v43 = vpop.f32.mrb[16].mxu0 }
 0x48a   :  { %v2557_v44 = vpop.f32.mrb[17].mxu0 }
 0x48b   :  { %v681_v45 = vpop.f32.mrb[18].mxu0 }
 0x48c   :  { %v761_v46 = vpack.c.bf16 %v681_v45, %v678_v43  ;;  %v2558_v47 = vpop.f32.mrb[19].mxu0 }
 0x48d   :  { %v2761_v47 = vld [vmem:[#allocation2 + $0x88] sm:$0xff]  }
 0x48e   :  { %2566 = vmatpush3.bf16.msra.mxu0 %v761_v46 }
 0x48f   :  { %2577 = vmatprep.subr.bf16.mxu0 %v2938_v1 }
 0x50c   :  { %v445_v48 = vpop.xlane.xlu1 %444 }
 0x50d   :  { %v449_v49 = vsub.f32 %v441_v36, %v445_v48 }
 0x50f   :  { %v451_v50 = vmul.f32 1.442695, %v449_v49 }
 0x510   :  { %v448_v51 = vpop.xlane.xlu1 %447 }
 0x511   :  { %2803 = vpow2.f32 %v451_v50  ;;  %v450_v52 = vsub.f32 %v442_v37, %v448_v51 }
 0x513   :  { %v453_v53 = vmul.f32 1.442695, %v450_v52 }
 0x515   :  { %2805 = vpow2.f32 %v453_v53 }
 0x51b   :  { %v2804_v54 = vpop.eup %2803 }
 0x51c   :  { %v455_v55 = vsel %vm391_vm9, %v2804_v54, 0.0 }
 0x51d   :  { %456 = vadd.xlane.f32.xlu1 %v455_v55 }
 0x51f   :  { %v2806_v56 = vpop.eup %2805 }
 0x520   :  { %v458_v57 = vsel %vm391_vm9, %v2806_v56, 0.0 }
 0x521   :  { %459 = vadd.xlane.f32.xlu1 %v458_v57 }
 0x5aa   :  { %v457_v58 = vpop.xlane.xlu1 %456 }
 0x5ab   :  { %2807 = vrcp.f32 %v457_v58 }
 0x5ae   :  { %v460_v60 = vpop.xlane.xlu1 %459 }
 0x5af   :  { %2809 = vrcp.f32 %v460_v60 }
 0x5b5   :  { %v2808_v61 = vpop.eup %2807 }
 0x5b6   :  { %v463_v63 = vmul.f32 %v2808_v61, %v2804_v54 }
 0x5b9   :  { %v2810_v62 = vpop.eup %2809 }
 0x5ba   :  { %v464_v0 = vmul.f32 %v2810_v62, %v2806_v56  ;;  %v2326_v62 = vld [vmem:[#allocation5 + $0x10] ss:$0 sm:$0xff] }
 0x5bc   :  { %v465_v3 = vpack.c.bf16 %v464_v0, %v463_v63 }
 0x5be   :  { %2532 = vmatmul.mubr.msk.bf16.vlgmr.msra.gmra.mrb[8].mxu1 %vm391_vm9, %v465_v3 }
 0x5bf   :  { %2544 = vmatpush3.bf16.msra.mxu1 %v2759_v2  ;;  %2547 = vmatprep.mubr.msk.bf16.mxu1 %vm2939_vm0, %v2938_v1 }
 0x5c0   :  { %2545 = vmatprep.subr.bf16.mxu1 %v2938_v1 }
 0x5c3   :  { %2546 = vmatpush3.bf16.msra.mxu1 %v2760_v4 }
 0x5c4   :  { %2559 = vmatprep.subr.bf16.mxu1 %v2938_v1 }
 0x5c6   :  { %2548 = vmatmul.mubr.msk.bf16.vlgmr.msra.gmra.mrb[12].mxu1 %vm172_vm8, %v3050_v59 }
 0x5c7   :  { %2561 = vmatprep.mubr.msk.bf16.mxu1 %vm2939_vm0, %v2938_v1 }
 0x691   :  { %v504_v5 = vpop.f32.mrb[8].mxu1 }
 0x692   :  { %v2533_v6 = vpop.f32.mrb[9].mxu1 }
 0x693   :  { %v507_v7 = vpop.f32.mrb[10].mxu1 }
 0x694   :  { %v513_v8 = vpack.c.bf16 %v507_v7, %v504_v5  ;;  %v2534_v9 = vpop.f32.mrb[11].mxu1 }
 0x699   :  { %v621_v15 = vpop.f32.mrb[12].mxu1 }
 0x69a   :  { %v2549_v16 = vpop.f32.mrb[13].mxu1 }
 0x69b   :  { %v624_v17 = vpop.f32.mrb[14].mxu1 }
 0x69c   :  { %v686_v18 = vpack.c.bf16 %v624_v17, %v621_v15  ;;  %v2550_v19 = vpop.f32.mrb[15].mxu1 }
 0x69e   :  { %v691_v20 = vsel %vm391_vm9, %v686_v18, 0 }
 0x69f   :  { %2560 = vmatpush3.bf16.xpose.msra.mxu1 %v691_v20 }
 0x6a0   :  { %2571 = vmatprep.subr.bf16.mxu1 %v2938_v1 }
 0x6a6   :  { %2562 = vmatmul.mubr.msk.bf16.vlgmr.msra.gmra.mrb[16].mxu1 %vm391_vm9, %v685_v41 }
 0x6a7   :  { %2573 = vmatprep.mubr.msk.bf16.mxu1 %vm2939_vm0, %v2938_v1  ;;  %2572 = vmatpush3.bf16.msra.mxu1 %v2762_v40 }
 0x6a8   :  { %2583 = vmatprep.subr.bf16.mxu1 %v2938_v1 }
 0x779   :  { %v727_v59 = vpop.f32.mrb[16].mxu1 }
 0x77a   :  { %v734_v21 = vmul.f32 0.25, %v727_v59  ;;  %v2563_v23 = vpop.f32.mrb[17].mxu1 }
 0x77b   :  { %v730_v24 = vpop.f32.mrb[18].mxu1  ;;  %v2764_v23 = vld [vmem:[#allocation2 + $0xa0] sm:$0xff]  }
 0x77c   :  { %v735_v26 = vmul.f32 0.25, %v730_v24  ;;  %v2564_v27 = vpop.f32.mrb[19].mxu1  ;;  %v736_v28 = vadd.f32 %v734_v21, %v3096_v31  ;;  %v2763_v21 = vld [vmem:[#allocation2 + $0x98] sm:$0xff]   ;;  %v2765_v24 = vld [vmem:[#allocation2 + $0xa8] sm:$0xff]  }
 0x77d   :  { %v2767_v27 = vld [vmem:[#allocation2 + $0xb8] sm:$0xff]  }
 0x77e   :  { %v738_v29 = vsel %vm391_vm9, %v736_v28, -inf  ;;  %v737_v30 = vadd.f32 %v735_v26, %v3098_v34  ;;  %v2766_v26 = vld [vmem:[#allocation2 + $0xb0] sm:$0xff]  }
 0x77f   :  { %739 = vmax.xlane.f32.xlu1 %v738_v29  ;;  %v2769_v29 = vld [vmem:[#allocation2 + $0xc8] sm:$0xff]  }
 0x780   :  { %v741_v12 = vsel %vm391_vm9, %v737_v30, -inf }
 0x783   :  { %742 = vmax.xlane.f32.xlu1 %v741_v12 }
 0x80c   :  { %v740_v32 = vpop.xlane.xlu1 %739 }
 0x80d   :  { %v744_v33 = vsub.f32 %v736_v28, %v740_v32  ;;  %v2768_v28 = vld [vmem:[#allocation2 + $0xc0] sm:$0xff]  }
 0x80f   :  { %v746_v13 = vmul.f32 1.442695, %v744_v33 }
 0x810   :  { %v743_v35 = vpop.xlane.xlu1 %742 }
 0x811   :  { %2811 = vpow2.f32 %v746_v13  ;;  %v745_v36 = vsub.f32 %v737_v30, %v743_v35  ;;  %v2770_v30 = vld [vmem:[#allocation2 + $0xd0] sm:$0xff]  }
 0x813   :  { %v748_v10 = vmul.f32 1.442695, %v745_v36 }
 0x815   :  { %2813 = vpow2.f32 %v748_v10 }
 0x81b   :  { %v2812_v37 = vpop.eup %2811 }
 0x81c   :  { %v750_v11 = vsel %vm391_vm9, %v2812_v37, 0.0 }
 0x81d   :  { %751 = vadd.xlane.f32.xlu1 %v750_v11 }
 0x81f   :  { %v2814_v38 = vpop.eup %2813 }
 0x820   :  { %v753_v39 = vsel %vm391_vm9, %v2814_v38, 0.0 }
 0x821   :  { %754 = vadd.xlane.f32.xlu0 %v753_v39 }
 0x8aa   :  { %v752_v41 = vpop.xlane.xlu1 %751 }
 0x8ab   :  { %2815 = vrcp.f32 %v752_v41  ;;  %v2328_v41 = vld [vmem:[#allocation5 + $0x20] ss:$0 sm:$0xff] }
 0x8ae   :  { %v755_v42 = vpop.xlane.xlu0 %754 }
 0x8af   :  { %2817 = vrcp.f32 %v755_v42 }
 0x8b5   :  { %v2816_v43 = vpop.eup %2815 }
 0x8b6   :  { %v758_v45 = vmul.f32 %v2816_v43, %v2812_v37  ;;  %v2327_v37 = vld [vmem:[#allocation5 + $0x18] ss:$0 sm:$0xff] }
 0x8b9   :  { %v2818_v44 = vpop.eup %2817 }
 0x8ba   :  { %v759_v46 = vmul.f32 %v2818_v44, %v2814_v38 }
 0x8bc   :  { %v760_v48 = vpack.c.bf16 %v759_v46, %v758_v45  ;;  %v2771_v46 = vld [vmem:[#allocation2 + $0xd8] sm:$0xff]  }
 0x8be   :  { %2568 = vmatmul.mubr.msk.bf16.vlgmr.msra.gmra.mrb[20].mxu0 %vm391_vm9, %v760_v48  ;;  %v2329_v48 = vld [vmem:[#allocation5 + $0x28] ss:$0 sm:$0xff] }
 0x8bf   :  { %2578 = vmatpush3.bf16.msra.mxu0 %v2761_v47  ;;  %2579 = vmatprep.mubr.msk.bf16.mxu0 %vm2939_vm0, %v2938_v1  ;;  %v2772_v47 = vld [vmem:[#allocation2 + $0xe0] sm:$0xff]  }
 0x8c0   :  { %2591 = vmatprep.subr.bf16.mxu0 %v2938_v1 }
 0x8c6   :  { %2580 = vmatmul.mubr.msk.bf16.vlgmr.msra.gmra.mrb[24].mxu0 %vm391_vm9, %v513_v8 }
 0x8c7   :  { %2607 = vmatprep.mubr.msk.bf16.mxu0 %vm2939_vm0, %v2938_v1  ;;  %2592 = vmatpush3.bf16.msra.mxu0 %v2765_v24 }
 0x8c8   :  { %2593 = vmatprep.subr.bf16.mxu0 %v2938_v1 }
 0x8cb   :  { %2594 = vmatpush3.bf16.msra.mxu0 %v2766_v26 }
 0x8cc   :  { %2595 = vmatprep.subr.bf16.mxu0 %v2938_v1 }
 0x8cf   :  { %2596 = vmatpush3.bf16.msra.mxu0 %v2767_v27 }
 0x8d0   :  { %2597 = vmatprep.subr.bf16.mxu0 %v2938_v1 }
 0x8d3   :  { %2598 = vmatpush3.bf16.msra.mxu0 %v2768_v28 }
 0x8d4   :  { %2599 = vmatprep.subr.bf16.mxu0 %v2938_v1 }
 0x8d7   :  { %2600 = vmatpush3.bf16.msra.mxu0 %v2769_v29 }
 0x8d8   :  { %2601 = vmatprep.subr.bf16.mxu0 %v2938_v1 }
 0x8db   :  { %2602 = vmatpush3.bf16.msra.mxu0 %v2770_v30  ;;  %v2342_v30 = vld [vmem:[#allocation5 + $0x38] ss:$0 sm:$0xff] }
 0x8dc   :  { %2603 = vmatprep.subr.bf16.mxu0 %v2938_v1 }
 0x8df   :  { %2604 = vmatpush3.bf16.msra.mxu0 %v2771_v46 }
 0x8e0   :  { %2605 = vmatprep.subr.bf16.mxu0 %v2938_v1 }
 0x8e3   :  { %2606 = vmatpush3.bf16.msra.mxu0 %v2772_v47 }
 0x8e4   :  { %2641 = vmatprep.subr.bf16.mxu0 %v2938_v1 }
 0x991   :  { %v799_v49 = vpop.f32.mrb[20].mxu0 }
 0x992   :  { %v2569_v50 = vpop.f32.mrb[21].mxu0 }
 0x993   :  { %v802_v51 = vpop.f32.mrb[22].mxu0 }
 0x994   :  { %v808_v52 = vpack.c.bf16 %v802_v51, %v799_v49  ;;  %v2570_v53 = vpop.f32.mrb[23].mxu0 }
 0x996   :  { %2574 = vmatmul.mubr.msk.bf16.vlgmr.msra.gmra.mrb[20].mxu1 %vm391_vm9, %v808_v52 }
 0x997   :  { %2587 = vmatprep.mubr.msk.bf16.mxu1 %vm2939_vm0, %v2938_v1  ;;  %2584 = vmatpush3.bf16.msra.mxu1 %v2763_v21 }
 0x998   :  { %2585 = vmatprep.subr.bf16.mxu1 %v2938_v1 }
 0x999   :  { %v902_v54 = vpop.f32.mrb[24].mxu0 }
 0x99a   :  { %v2581_v55 = vpop.f32.mrb[25].mxu0 }
 0x99b   :  { %v905_v56 = vpop.f32.mrb[26].mxu0  ;;  %2586 = vmatpush3.bf16.msra.mxu1 %v2764_v23 }
 0x99c   :  { %v2582_v57 = vpop.f32.mrb[27].mxu0  ;;  %2611 = vmatprep.subr.bf16.mxu1 %v2938_v1 }
 0xa69   :  { %v852_v58 = vpop.f32.mrb[20].mxu1 }
 0xa6a   :  { %v903_v60 = vadd.f32 %v902_v54, %v852_v58  ;;  %v2575_v61 = vpop.f32.mrb[21].mxu1 }
 0xa6b   :  { %v855_v63 = vpop.f32.mrb[22].mxu1 }
 0xa6c   :  { %v909_v0 = vadd.f32 %v903_v60, %v3034_v22  ;;  %v906_v2 = vadd.f32 %v905_v56, %v855_v63  ;;  %v2576_v3 = vpop.f32.mrb[23].mxu1  ;;  %v2341_v60 = vld [vmem:[#allocation5 + $0x30] ss:$0 sm:$0xff] }
 0xa6e   :  { %v3139_v4 = vadd.f32 %v2326_v62, %v909_v0  ;;  %v910_v5 = vadd.f32 %v906_v2, %v3038_v25 }
 0xa70   :  { %v3142_v6 = vadd.f32 %v2326_v62, %v910_v5  ;;  %v918_v7 = vsel %vm172_vm8, %v3139_v4, 0.0 }
 0xa71   :  { %919 = vadd.xlane.f32.xlu1 %v918_v7 }
 0xa72   :  { %v921_v8 = vsel %vm172_vm8, %v3142_v6, 0.0 }
 0xa73   :  { %922 = vadd.xlane.f32.xlu0 %v921_v8 }
 0xafe   :  { %v920_v9 = vpop.xlane.xlu1 %919 }
 0xaff   :  { %v924_v15 = vmul.f32 0.03125, %v920_v9 }
 0xb00   :  { %v923_v16 = vpop.xlane.xlu0 %922 }
 0xb01   :  { %v926_v22 = vsub.f32 %v3139_v4, %v924_v15  ;;  %v925_v17 = vmul.f32 0.03125, %v923_v16 }
 0xb03   :  { %v927_v18 = vsub.f32 %v3142_v6, %v925_v17  ;;  %v928_v19 = vmul.f32 %v926_v22, %v926_v22 }
 0xb05   :  { %v930_v25 = vsel %vm172_vm8, %v928_v19, 0.0  ;;  %v929_v20 = vmul.f32 %v927_v18, %v927_v18 }
 0xb06   :  { %931 = vadd.xlane.f32.xlu1 %v930_v25 }
 0xb07   :  { %v933_v59 = vsel %vm172_vm8, %v929_v20, 0.0  ;;  %v2773_v20 = vld [vmem:[#allocation2 + $0xe8] sm:$0xff]  }
 0xb08   :  { %934 = vadd.xlane.f32.xlu0 %v933_v59  ;;  %v2774_v59 = vld [vmem:[#allocation2 + $0xf0] sm:$0xff]  }
 0xb93   :  { %v932_v12 = vpop.xlane.xlu1 %931 }
 0xb94   :  { %v936_v32 = vmul.f32 0.03125, %v932_v12 }
 0xb95   :  { %v935_v33 = vpop.xlane.xlu0 %934 }
 0xb96   :  { %v938_v13 = vadd.f32 1e-05, %v936_v32  ;;  %v937_v35 = vmul.f32 0.03125, %v935_v33 }
 0xb98   :  { %2819 = vrsqrt.f32 %v938_v13  ;;  %v939_v36 = vadd.f32 1e-05, %v937_v35  ;;  %v2343_v35 = vld [vmem:[#allocation5 + $0x40] ss:$0 sm:$0xff] }
 0xb9a   :  { %2821 = vrsqrt.f32 %v939_v36 }
 0xba2   :  { %v2820_v10 = vpop.eup %2819 }
 0xba3   :  { %v942_v11 = vmul.f32 %v2820_v10, %v926_v22 }
 0xba4   :  { %v2822_v38 = vpop.eup %2821 }
 0xba5   :  { %v949_v39 = vmul.f32 %v2327_v37, %v942_v11  ;;  %v943_v40 = vmul.f32 %v2822_v38, %v927_v18  ;;  %v2775_v11 = vld [vmem:[#allocation2 + $0xf8] sm:$0xff]  }
 0xba7   :  { %v950_v42 = vmul.f32 %v2327_v37, %v943_v40  ;;  %v956_v43 = vadd.f32 %v2328_v41, %v949_v39  ;;  %v2776_v39 = vld [vmem:[#allocation2 + $0x100] sm:$0xff]   ;;  %v2777_v40 = vld [vmem:[#allocation2 + $0x108] sm:$0xff]  }
 0xba9   :  { %v957_v44 = vadd.f32 %v2328_v41, %v950_v42  ;;  %v2778_v41 = vld [vmem:[#allocation2 + $0x110] sm:$0xff]  }
 0xbab   :  { %v958_v45 = vpack.c.bf16 %v957_v44, %v956_v43 }
 0xbad   :  { %2588 = vmatmul.mubr.msk.bf16.vlgmr.msra.gmra.mrb[24].mxu1 %vm172_vm8, %v958_v45 }
 0xbae   :  { %2615 = vmatprep.mubr.msk.bf16.mxu1 %vm2939_vm0, %v2938_v1  ;;  %2612 = vmatpush3.bf16.msra.mxu1 %v2773_v20 }
 0xbaf   :  { %2613 = vmatprep.subr.bf16.mxu1 %v2938_v1 }
 0xbb2   :  { %2614 = vmatpush3.bf16.msra.mxu1 %v2774_v59 }
 0xbb3   :  { %2619 = vmatprep.subr.bf16.mxu1 %v2938_v1 }
 0xc80   :  { %v1017_v49 = vpop.f32.mrb[24].mxu1 }
 0xc81   :  { %v1018_v50 = vadd.f32 %v2329_v48, %v1017_v49  ;;  %v2589_v51 = vpop.f32.mrb[25].mxu1 }
 0xc82   :  { %v1020_v52 = vpop.f32.mrb[26].mxu1 }
 0xc83   :  { %v1021_v53 = vadd.f32 %v2329_v48, %v1020_v52  ;;  %v2590_v54 = vpop.f32.mrb[27].mxu1  ;;  %v1024_v55 = vmax.f32 %v1018_v50, 0.0 }
 0xc85   :  { %v1025_v56 = vmax.f32 %v1021_v53, 0.0 }
 0xc87   :  { %v1026_v57 = vpack.c.bf16 %v1025_v56, %v1024_v55  ;;  %v2779_v56 = vld [vmem:[#allocation2 + $0x118] sm:$0xff]  }
 0xc89   :  { %2608 = vmatmul.mubr.bf16.vlgmr.msra.gmra.mrb[28].mxu0 %v1026_v57 }
 0xc8a   :  { %2643 = vmatprep.mubr.msk.bf16.mxu0 %vm2939_vm0, %v2938_v1 }
 0xd5c   :  { %v1125_v58 = vpop.f32.mrb[28].mxu0 }
 0xd5d   :  { %v1132_v61 = vadd.f32 %v1125_v58, %v3139_v4  ;;  %v2609_v62 = vpop.f32.mrb[29].mxu0 }
 0xd5e   :  { %v1128_v63 = vpop.f32.mrb[30].mxu0  ;;  %v2782_v62 = vld [vmem:[#allocation2 + $0x140] sm:$0xff]  }
 0xd5f   :  { %v3168_v0 = vadd.f32 %v2341_v60, %v1132_v61  ;;  %v1133_v2 = vadd.f32 %v1128_v63, %v3142_v6  ;;  %v2610_v3 = vpop.f32.mrb[31].mxu0  ;;  %v2781_v61 = vld [vmem:[#allocation2 + $0x138] sm:$0xff]  }
 0xd61   :  { %v3171_v5 = vadd.f32 %v2341_v60, %v1133_v2  ;;  %v1141_v7 = vsel %vm172_vm8, %v3168_v0, 0.0  ;;  %v2780_v60 = vld [vmem:[#allocation2 + $0x120] sm:$0xff]  }
 0xd62   :  { %1142 = vadd.xlane.f32.xlu1 %v1141_v7 }
 0xd63   :  { %v1144_v8 = vsel %vm172_vm8, %v3171_v5, 0.0 }
 0xd64   :  { %1145 = vadd.xlane.f32.xlu0 %v1144_v8 }
 0xdef   :  { %v1143_v9 = vpop.xlane.xlu1 %1142 }
 0xdf0   :  { %v1147_v15 = vmul.f32 0.03125, %v1143_v9 }
 0xdf1   :  { %v1146_v4 = vpop.xlane.xlu0 %1145 }
 0xdf2   :  { %v1149_v16 = vsub.f32 %v3168_v0, %v1147_v15  ;;  %v1148_v22 = vmul.f32 0.03125, %v1146_v4 }
 0xdf4   :  { %v1150_v17 = vsub.f32 %v3171_v5, %v1148_v22  ;;  %v1151_v6 = vmul.f32 %v1149_v16, %v1149_v16 }
 0xdf6   :  { %v1153_v18 = vsel %vm172_vm8, %v1151_v6, 0.0  ;;  %v1152_v19 = vmul.f32 %v1150_v17, %v1150_v17 }
 0xdf7   :  { %1154 = vadd.xlane.f32.xlu1 %v1153_v18 }
 0xdf8   :  { %v1156_v25 = vsel %vm172_vm8, %v1152_v19, 0.0 }
 0xdf9   :  { %1157 = vadd.xlane.f32.xlu0 %v1156_v25 }
 0xe84   :  { %v1155_v21 = vpop.xlane.xlu1 %1154 }
 0xe85   :  { %v1159_v23 = vmul.f32 0.03125, %v1155_v21 }
 0xe86   :  { %v1158_v24 = vpop.xlane.xlu0 %1157 }
 0xe87   :  { %v1161_v26 = vadd.f32 1e-05, %v1159_v23  ;;  %v1160_v27 = vmul.f32 0.03125, %v1158_v24 }
 0xe89   :  { %2823 = vrsqrt.f32 %v1161_v26  ;;  %v1162_v28 = vadd.f32 1e-05, %v1160_v27 }
 0xe8b   :  { %2825 = vrsqrt.f32 %v1162_v28 }
 0xe93   :  { %v2824_v29 = vpop.eup %2823 }
 0xe94   :  { %v1165_v12 = vmul.f32 %v2824_v29, %v1149_v16 }
 0xe95   :  { %v2826_v32 = vpop.eup %2825 }
 0xe96   :  { %v1172_v33 = vmul.f32 %v2342_v30, %v1165_v12  ;;  %v1166_v13 = vmul.f32 %v2826_v32, %v1150_v17 }
 0xe98   :  { %v1173_v36 = vmul.f32 %v2342_v30, %v1166_v13  ;;  %v1179_v10 = vadd.f32 %v2343_v35, %v1172_v33 }
 0xe9a   :  { %v1180_v37 = vadd.f32 %v2343_v35, %v1173_v36 }
 0xe9c   :  { %v3183_v38 = vpack.c.bf16 %v1180_v37, %v1179_v10 }
 0xe9e   :  { %2616 = vmatmul.mubr.msk.bf16.vlgmr.msra.gmra.mrb[28].mxu1 %vm172_vm8, %v3183_v38 }
 0xe9f   :  { %2620 = vmatpush3.bf16.msra.mxu1 %v2775_v11  ;;  %2623 = vmatprep.mubr.msk.bf16.mxu1 %vm2939_vm0, %v2938_v1 }
 0xea0   :  { %2621 = vmatprep.subr.bf16.mxu1 %v2938_v1 }
 0xea3   :  { %2622 = vmatpush3.bf16.msra.mxu1 %v2776_v39 }
 0xea4   :  { %2627 = vmatprep.subr.bf16.mxu1 %v2938_v1 }
 0xea6   :  { %2624 = vmatmul.mubr.msk.bf16.vlgmr.msra.gmra.mrb[32].mxu1 %vm172_vm8, %v3183_v38 }
 0xea7   :  { %2628 = vmatpush3.bf16.msra.mxu1 %v2777_v40  ;;  %2631 = vmatprep.mubr.msk.bf16.mxu1 %vm2939_vm0, %v2938_v1 }
 0xea8   :  { %2629 = vmatprep.subr.bf16.mxu1 %v2938_v1 }
 0xeab   :  { %2630 = vmatpush3.bf16.msra.mxu1 %v2778_v41  ;;  %v2783_v41 = vld [vmem:[#allocation2 + $0x128] sm:$0xff]  }
 0xeac   :  { %2635 = vmatprep.subr.bf16.mxu1 %v2938_v1 }
 0xeae   :  { %2632 = vmatmul.mubr.msk.bf16.vlgmr.msra.gmra.mrb[36].mxu1 %vm172_vm8, %v3183_v38 }
 0xeaf   :  { %2637 = vmatprep.mubr.msk.bf16.mxu1 %vm2939_vm0, %v2938_v1 }
 0xf71   :  { %v1235_v42 = vpop.f32.mrb[28].mxu1 }
 0xf72   :  { %v2617_v43 = vpop.f32.mrb[29].mxu1 }
 0xf73   :  { %v1238_v44 = vpop.f32.mrb[30].mxu1  ;;  %v2784_v43 = vld [vmem:[#allocation2 + $0x130] sm:$0xff]  }
 0xf74   :  { %v1356_v45 = vpack.c.bf16 %v1238_v44, %v1235_v42  ;;  %v2618_v46 = vpop.f32.mrb[31].mxu1 }
 0xf79   :  { %v1292_v47 = vpop.f32.mrb[32].mxu1 }
 0xf7a   :  { %v2625_v48 = vpop.f32.mrb[33].mxu1 }
 0xf7b   :  { %v1295_v49 = vpop.f32.mrb[34].mxu1 }
 0xf7c   :  { %v1357_v50 = vpack.c.bf16 %v1295_v49, %v1292_v47  ;;  %v2626_v51 = vpop.f32.mrb[35].mxu1 }
 0xf7e   :  { %v1362_v52 = vsel %vm391_vm9, %v1357_v50, 0 }
 0xf7f   :  { %2636 = vmatpush3.bf16.xpose.msra.mxu1 %v1362_v52 }
 0xf80   :  { %2647 = vmatprep.subr.bf16.mxu1 %v2938_v1 }
 0xf81   :  { %v1349_v53 = vpop.f32.mrb[36].mxu1 }
 0xf82   :  { %v2633_v54 = vpop.f32.mrb[37].mxu1 }
 0xf83   :  { %v1352_v55 = vpop.f32.mrb[38].mxu1 }
 0xf84   :  { %v1432_v57 = vpack.c.bf16 %v1352_v55, %v1349_v53  ;;  %v2634_v58 = vpop.f32.mrb[39].mxu1 }
 0xf86   :  { %2638 = vmatmul.mubr.msk.bf16.vlgmr.msra.gmra.mrb[40].mxu1 %vm391_vm9, %v1356_v45  ;;  %2642 = vmatpush3.bf16.msra.mxu0 %v1432_v57 }
 0xf87   :  { %2648 = vmatpush3.bf16.msra.mxu1 %v2779_v56  ;;  %2651 = vmatprep.mubr.msk.bf16.mxu1 %vm2939_vm0, %v2938_v1 }
 0xf88   :  { %2649 = vmatprep.subr.bf16.mxu1 %v2938_v1  ;;  %2655 = vmatprep.subr.bf16.mxu0 %v2938_v1 }
 0xf8b   :  { %2650 = vmatpush3.bf16.msra.mxu1 %v2780_v60 }
 0xf8c   :  { %2663 = vmatprep.subr.bf16.mxu1 %v2938_v1 }
 0xf8e   :  { %2652 = vmatmul.mubr.msk.bf16.vlgmr.msra.gmra.mrb[44].mxu1 %vm172_vm8, %v3183_v38 }
 0xf8f   :  { %2664 = vmatpush3.bf16.msra.mxu1 %v2781_v61  ;;  %2667 = vmatprep.mubr.msk.bf16.mxu1 %vm2939_vm0, %v2938_v1 }
 0xf90   :  { %2665 = vmatprep.subr.bf16.mxu1 %v2938_v1 }
 0xf93   :  { %2666 = vmatpush3.bf16.msra.mxu1 %v2782_v62 }
 0xf94   :  { %2677 = vmatprep.subr.bf16.mxu1 %v2938_v1 }
 0xf96   :  { %2668 = vmatmul.mubr.msk.bf16.vlgmr.msra.gmra.mrb[48].mxu1 %vm172_vm8, %v3183_v38 }
 0xf97   :  { %2679 = vmatprep.mubr.msk.bf16.mxu1 %vm2939_vm0, %v2938_v1 }
0x1059   :  { %v1398_v63 = vpop.f32.mrb[40].mxu1 }
0x105a   :  { %v1405_v2 = vmul.f32 0.25, %v1398_v63  ;;  %v2639_v3 = vpop.f32.mrb[41].mxu1 }
0x105b   :  { %v1401_v7 = vpop.f32.mrb[42].mxu1 }
0x105c   :  { %v1406_v8 = vmul.f32 0.25, %v1401_v7  ;;  %v2640_v9 = vpop.f32.mrb[43].mxu1  ;;  %v1407_v15 = vadd.f32 %v1405_v2, %v3096_v31 }
0x105e   :  { %v1409_v4 = vsel %vm391_vm9, %v1407_v15, -inf  ;;  %v1408_v16 = vadd.f32 %v1406_v8, %v3098_v34 }
0x105f   :  { %1410 = vmax.xlane.f32.xlu1 %v1409_v4 }
0x1060   :  { %v1412_v22 = vsel %vm391_vm9, %v1408_v16, -inf }
0x1061   :  { %1413 = vmax.xlane.f32.xlu0 %v1412_v22  ;;  %v1530_v17 = vpop.f32.mrb[44].mxu1 }
0x1062   :  { %v2653_v6 = vpop.f32.mrb[45].mxu1 }
0x1063   :  { %v1533_v18 = vpop.f32.mrb[46].mxu1 }
0x1064   :  { %v1651_v19 = vpack.c.bf16 %v1533_v18, %v1530_v17  ;;  %v2654_v25 = vpop.f32.mrb[47].mxu1 }
0x1069   :  { %v1644_v20 = vpop.f32.mrb[48].mxu1 }
0x106a   :  { %v2669_v59 = vpop.f32.mrb[49].mxu1 }
0x106b   :  { %v1647_v21 = vpop.f32.mrb[50].mxu1 }
0x106c   :  { %v1727_v23 = vpack.c.bf16 %v1647_v21, %v1644_v20  ;;  %v2670_v24 = vpop.f32.mrb[51].mxu1  ;;  %v2785_v21 = vld [vmem:[#allocation2 + $0x148] sm:$0xff]  }
0x106e   :  { %2678 = vmatpush3.bf16.msra.mxu1 %v1727_v23 }
0x106f   :  { %2689 = vmatprep.subr.bf16.mxu1 %v2938_v1 }
0x10ec   :  { %v1411_v26 = vpop.xlane.xlu1 %1410 }
0x10ed   :  { %v1415_v27 = vsub.f32 %v1407_v15, %v1411_v26 }
0x10ee   :  { %v1414_v28 = vpop.xlane.xlu0 %1413 }
0x10ef   :  { %v1417_v29 = vmul.f32 1.442695, %v1415_v27  ;;  %v1416_v30 = vsub.f32 %v1408_v16, %v1414_v28 }
0x10f1   :  { %2827 = vpow2.f32 %v1417_v29  ;;  %v1419_v12 = vmul.f32 1.442695, %v1416_v30 }
0x10f3   :  { %2829 = vpow2.f32 %v1419_v12 }
0x10fb   :  { %v2828_v32 = vpop.eup %2827 }
0x10fc   :  { %v1421_v33 = vsel %vm391_vm9, %v2828_v32, 0.0 }
0x10fd   :  { %v2830_v13 = vpop.eup %2829  ;;  %1422 = vadd.xlane.f32.xlu1 %v1421_v33 }
0x10fe   :  { %v1424_v35 = vsel %vm391_vm9, %v2830_v13, 0.0 }
0x10ff   :  { %1425 = vadd.xlane.f32.xlu0 %v1424_v35 }
0x118a   :  { %v1423_v36 = vpop.xlane.xlu1 %1422 }
0x118b   :  { %2831 = vrcp.f32 %v1423_v36 }
0x118c   :  { %v1426_v10 = vpop.xlane.xlu0 %1425 }
0x118d   :  { %2833 = vrcp.f32 %v1426_v10  ;;  %v2370_v10 = vld [vmem:[#allocation5 + $0x48] ss:$0 sm:$0xff] }
0x1195   :  { %v2832_v37 = vpop.eup %2831 }
0x1196   :  { %v1429_v39 = vmul.f32 %v2832_v37, %v2828_v32 }
0x1197   :  { %v2834_v11 = vpop.eup %2833 }
0x1198   :  { %v1430_v40 = vmul.f32 %v2834_v11, %v2830_v13 }
0x119a   :  { %v1431_v42 = vpack.c.bf16 %v1430_v40, %v1429_v39 }
0x119c   :  { %2644 = vmatmul.mubr.msk.bf16.vlgmr.msra.gmra.mrb[32].mxu0 %vm391_vm9, %v1431_v42 }
0x119d   :  { %2656 = vmatpush3.bf16.msra.mxu0 %v2783_v41  ;;  %2659 = vmatprep.mubr.msk.bf16.mxu0 %vm2939_vm0, %v2938_v1 }
0x119e   :  { %2657 = vmatprep.subr.bf16.mxu0 %v2938_v1 }
0x11a1   :  { %2658 = vmatpush3.bf16.msra.mxu0 %v2784_v43 }
0x11a2   :  { %2671 = vmatprep.subr.bf16.mxu0 %v2938_v1 }
0x11a4   :  { %2660 = vmatmul.mubr.msk.bf16.vlgmr.msra.gmra.mrb[36].mxu0 %vm172_vm8, %v3183_v38 }
0x11a5   :  { %2673 = vmatprep.mubr.msk.bf16.mxu0 %vm2939_vm0, %v2938_v1 }
0x126f   :  { %v1470_v44 = vpop.f32.mrb[32].mxu0 }
0x1270   :  { %v2645_v45 = vpop.f32.mrb[33].mxu0 }
0x1271   :  { %v1473_v46 = vpop.f32.mrb[34].mxu0 }
0x1272   :  { %v1479_v47 = vpack.c.bf16 %v1473_v46, %v1470_v44  ;;  %v2646_v48 = vpop.f32.mrb[35].mxu0 }
0x1277   :  { %v1587_v49 = vpop.f32.mrb[36].mxu0 }
0x1278   :  { %v2661_v50 = vpop.f32.mrb[37].mxu0 }
0x1279   :  { %v1590_v51 = vpop.f32.mrb[38].mxu0 }
0x127a   :  { %v1652_v52 = vpack.c.bf16 %v1590_v51, %v1587_v49  ;;  %v2662_v53 = vpop.f32.mrb[39].mxu0 }
0x127c   :  { %v1657_v54 = vsel %vm391_vm9, %v1652_v52, 0 }
0x127d   :  { %2672 = vmatpush3.bf16.xpose.msra.mxu0 %v1657_v54  ;;  %v2787_v54 = vld [vmem:[#allocation2 + $0x158] sm:$0xff]  }
0x127e   :  { %2683 = vmatprep.subr.bf16.mxu0 %v2938_v1 }
0x1284   :  { %2674 = vmatmul.mubr.msk.bf16.vlgmr.msra.gmra.mrb[40].mxu0 %vm391_vm9, %v1651_v19 }
0x1285   :  { %2685 = vmatprep.mubr.msk.bf16.mxu0 %vm2939_vm0, %v2938_v1 }
0x1357   :  { %v1693_v38 = vpop.f32.mrb[40].mxu0 }
0x1358   :  { %v1700_v55 = vmul.f32 0.25, %v1693_v38  ;;  %v2675_v56 = vpop.f32.mrb[41].mxu0  ;;  %v2788_v38 = vld [vmem:[#allocation2 + $0x160] sm:$0xff]  }
0x1359   :  { %v1696_v57 = vpop.f32.mrb[42].mxu0  ;;  %v2790_v56 = vld [vmem:[#allocation2 + $0x170] sm:$0xff]  }
0x135a   :  { %v1701_v58 = vmul.f32 0.25, %v1696_v57  ;;  %v2676_v60 = vpop.f32.mrb[43].mxu0  ;;  %v1702_v61 = vadd.f32 %v1700_v55, %v3096_v31  ;;  %v2789_v55 = vld [vmem:[#allocation2 + $0x168] sm:$0xff]   ;;  %v2791_v57 = vld [vmem:[#allocation2 + $0x178] sm:$0xff]  }
0x135b   :  { %v2793_v60 = vld [vmem:[#allocation2 + $0x188] sm:$0xff]  }
0x135c   :  { %v1704_v62 = vsel %vm391_vm9, %v1702_v61, -inf  ;;  %v1703_v63 = vadd.f32 %v1701_v58, %v3098_v34  ;;  %v2786_v34 = vld [vmem:[#allocation2 + $0x150] sm:$0xff]   ;;  %v2792_v58 = vld [vmem:[#allocation2 + $0x180] sm:$0xff]  }
0x135d   :  { %1705 = vmax.xlane.f32.xlu1 %v1704_v62  ;;  %2684 = vmatpush3.bf16.msra.mxu0 %v2786_v34 }
0x135e   :  { %v1707_v2 = vsel %vm391_vm9, %v1703_v63, -inf  ;;  %2695 = vmatprep.subr.bf16.mxu0 %v2938_v1 }
0x135f   :  { %1708 = vmax.xlane.f32.xlu0 %v1707_v2 }
0x13ea   :  { %v1706_v3 = vpop.xlane.xlu1 %1705 }
0x13eb   :  { %v1710_v7 = vsub.f32 %v1702_v61, %v1706_v3  ;;  %v2794_v61 = vld [vmem:[#allocation2 + $0x190] sm:$0xff]  }
0x13ec   :  { %v1709_v8 = vpop.xlane.xlu0 %1708 }
0x13ed   :  { %v1712_v9 = vmul.f32 1.442695, %v1710_v7  ;;  %v1711_v15 = vsub.f32 %v1703_v63, %v1709_v8 }
0x13ef   :  { %2835 = vpow2.f32 %v1712_v9  ;;  %v1714_v4 = vmul.f32 1.442695, %v1711_v15  ;;  %v2371_v15 = vld [vmem:[#allocation5 + $0x50] ss:$0 sm:$0xff] }
0x13f1   :  { %2837 = vpow2.f32 %v1714_v4 }
0x13f9   :  { %v2836_v16 = vpop.eup %2835 }
0x13fa   :  { %v1716_v22 = vsel %vm391_vm9, %v2836_v16, 0.0 }
0x13fb   :  { %v2838_v31 = vpop.eup %2837  ;;  %1717 = vadd.xlane.f32.xlu1 %v1716_v22 }
0x13fc   :  { %v1719_v17 = vsel %vm391_vm9, %v2838_v31, 0.0 }
0x13fd   :  { %1720 = vadd.xlane.f32.xlu0 %v1719_v17  ;;  %v2372_v17 = vld [vmem:[#allocation5 + $0x58] ss:$0 sm:$0xff] }
0x1488   :  { %v1718_v6 = vpop.xlane.xlu1 %1717 }
0x1489   :  { %2839 = vrcp.f32 %v1718_v6 }
0x148a   :  { %v1721_v18 = vpop.xlane.xlu0 %1720 }
0x148b   :  { %2841 = vrcp.f32 %v1721_v18 }
0x1493   :  { %v2840_v19 = vpop.eup %2839 }
0x1494   :  { %v1724_v20 = vmul.f32 %v2840_v19, %v2836_v16 }
0x1495   :  { %v2842_v25 = vpop.eup %2841 }
0x1496   :  { %v1725_v59 = vmul.f32 %v2842_v25, %v2838_v31  ;;  %v2795_v25 = vld [vmem:[#allocation2 + $0x198] sm:$0xff]  }
0x1498   :  { %v1726_v23 = vpack.c.bf16 %v1725_v59, %v1724_v20  ;;  %v2796_v20 = vld [vmem:[#allocation2 + $0x1a0] sm:$0xff]   ;;  %v2373_v59 = vld [vmem:[#allocation5 + $0x60] ss:$0 sm:$0xff] }
0x149a   :  { %2680 = vmatmul.mubr.msk.bf16.vlgmr.msra.gmra.mrb[52].mxu1 %vm391_vm9, %v1726_v23 }
0x149b   :  { %2690 = vmatpush3.bf16.msra.mxu1 %v2785_v21  ;;  %2691 = vmatprep.mubr.msk.bf16.mxu1 %vm2939_vm0, %v2938_v1 }
0x149c   :  { %2703 = vmatprep.subr.bf16.mxu1 %v2938_v1 }
0x14a2   :  { %2692 = vmatmul.mubr.msk.bf16.vlgmr.msra.gmra.mrb[56].mxu1 %vm391_vm9, %v1479_v47 }
0x14a3   :  { %2719 = vmatprep.mubr.msk.bf16.mxu1 %vm2939_vm0, %v2938_v1  ;;  %2704 = vmatpush3.bf16.msra.mxu1 %v2789_v55 }
0x14a4   :  { %2705 = vmatprep.subr.bf16.mxu1 %v2938_v1 }
0x14a7   :  { %2706 = vmatpush3.bf16.msra.mxu1 %v2790_v56 }
0x14a8   :  { %2707 = vmatprep.subr.bf16.mxu1 %v2938_v1 }
0x14ab   :  { %2708 = vmatpush3.bf16.msra.mxu1 %v2791_v57 }
0x14ac   :  { %2709 = vmatprep.subr.bf16.mxu1 %v2938_v1 }
0x14af   :  { %2710 = vmatpush3.bf16.msra.mxu1 %v2792_v58  ;;  %v2386_v58 = vld [vmem:[#allocation5 + $0x70] ss:$0 sm:$0xff] }
0x14b0   :  { %2711 = vmatprep.subr.bf16.mxu1 %v2938_v1 }
0x14b3   :  { %2712 = vmatpush3.bf16.msra.mxu1 %v2793_v60 }
0x14b4   :  { %2713 = vmatprep.subr.bf16.mxu1 %v2938_v1 }
0x14b7   :  { %2714 = vmatpush3.bf16.msra.mxu1 %v2794_v61 }
0x14b8   :  { %2715 = vmatprep.subr.bf16.mxu1 %v2938_v1 }
0x14bb   :  { %2716 = vmatpush3.bf16.msra.mxu1 %v2795_v25  ;;  %v2241_v25 = vld [vmem:[%s3326_s1 + $0x8] sm:$0xff] }
0x14bc   :  { %2717 = vmatprep.subr.bf16.mxu1 %v2938_v1 }
0x14bf   :  { %2718 = vmatpush3.bf16.msra.mxu1 %v2796_v20 }
0x156d   :  { %v1765_v24 = vpop.f32.mrb[52].mxu1 }
0x156e   :  { %v2681_v26 = vpop.f32.mrb[53].mxu1 }
0x156f   :  { %v1768_v27 = vpop.f32.mrb[54].mxu1 }
0x1570   :  { %v1774_v28 = vpack.c.bf16 %v1768_v27, %v1765_v24  ;;  %v2682_v29 = vpop.f32.mrb[55].mxu1 }
0x1572   :  { %2686 = vmatmul.mubr.msk.bf16.vlgmr.msra.gmra.mrb[44].mxu0 %vm391_vm9, %v1774_v28 }
0x1573   :  { %2699 = vmatprep.mubr.msk.bf16.mxu0 %vm2939_vm0, %v2938_v1  ;;  %2696 = vmatpush3.bf16.msra.mxu0 %v2787_v54 }
0x1574   :  { %2697 = vmatprep.subr.bf16.mxu0 %v2938_v1 }
0x1575   :  { %v1868_v30 = vpop.f32.mrb[56].mxu1 }
0x1576   :  { %v2693_v12 = vpop.f32.mrb[57].mxu1 }
0x1577   :  { %v1871_v32 = vpop.f32.mrb[58].mxu1  ;;  %2698 = vmatpush3.bf16.msra.mxu0 %v2788_v38 }
0x1578   :  { %v2694_v33 = vpop.f32.mrb[59].mxu1  ;;  %2723 = vmatprep.subr.bf16.mxu0 %v2938_v1 }
0x1579   :  { %v2385_v33 = vld [vmem:[#allocation5 + $0x68] ss:$0 sm:$0xff] }
0x1645   :  { %v1818_v13 = vpop.f32.mrb[44].mxu0 }
0x1646   :  { %v1869_v35 = vadd.f32 %v1868_v30, %v1818_v13  ;;  %v2687_v36 = vpop.f32.mrb[45].mxu0 }
0x1647   :  { %v1821_v37 = vpop.f32.mrb[46].mxu0 }
0x1648   :  { %v1875_v11 = vadd.f32 %v1869_v35, %v3168_v0  ;;  %v1872_v39 = vadd.f32 %v1871_v32, %v1821_v37  ;;  %v2688_v40 = vpop.f32.mrb[47].mxu0 }
0x164a   :  { %v3258_v41 = vadd.f32 %v2370_v10, %v1875_v11  ;;  %v1876_v42 = vadd.f32 %v1872_v39, %v3171_v5 }
0x164c   :  { %v3261_v43 = vadd.f32 %v2370_v10, %v1876_v42  ;;  %v1884_v44 = vsel %vm172_vm8, %v3258_v41, 0.0 }
0x164d   :  { %1885 = vadd.xlane.f32.xlu1 %v1884_v44 }
0x164e   :  { %v1887_v45 = vsel %vm172_vm8, %v3261_v43, 0.0 }
0x164f   :  { %1888 = vadd.xlane.f32.xlu0 %v1887_v45 }
0x16da   :  { %v1886_v46 = vpop.xlane.xlu1 %1885 }
0x16db   :  { %v1890_v47 = vmul.f32 0.03125, %v1886_v46 }
0x16dc   :  { %v1889_v48 = vpop.xlane.xlu0 %1888 }
0x16dd   :  { %v1892_v0 = vsub.f32 %v3258_v41, %v1890_v47  ;;  %v1891_v49 = vmul.f32 0.03125, %v1889_v48 }
0x16df   :  { %v1893_v50 = vsub.f32 %v3261_v43, %v1891_v49  ;;  %v1894_v51 = vmul.f32 %v1892_v0, %v1892_v0 }
0x16e1   :  { %v1896_v5 = vsel %vm172_vm8, %v1894_v51, 0.0  ;;  %v1895_v52 = vmul.f32 %v1893_v50, %v1893_v50  ;;  %v2797_v51 = vld [vmem:[#allocation2 + $0x1a8] sm:$0xff]  }
0x16e2   :  { %1897 = vadd.xlane.f32.xlu1 %v1896_v5  ;;  %v2798_v5 = vld [vmem:[#allocation2 + $0x1b0] sm:$0xff]  }
0x16e3   :  { %v1899_v53 = vsel %vm172_vm8, %v1895_v52, 0.0 }
0x16e4   :  { %1900 = vadd.xlane.f32.xlu0 %v1899_v53 }
0x176f   :  { %v1898_v62 = vpop.xlane.xlu1 %1897 }
0x1770   :  { %v1902_v63 = vmul.f32 0.03125, %v1898_v62 }
0x1771   :  { %v1901_v2 = vpop.xlane.xlu0 %1900 }
0x1772   :  { %v1904_v3 = vadd.f32 1e-05, %v1902_v63  ;;  %v1903_v7 = vmul.f32 0.03125, %v1901_v2  ;;  %v2387_v2 = vld [vmem:[#allocation5 + $0x78] ss:$0 sm:$0xff] }
0x1774   :  { %2843 = vrsqrt.f32 %v1904_v3  ;;  %v1905_v8 = vadd.f32 1e-05, %v1903_v7 }
0x1776   :  { %2845 = vrsqrt.f32 %v1905_v8 }
0x177e   :  { %v2844_v9 = vpop.eup %2843 }
0x177f   :  { %v1908_v4 = vmul.f32 %v2844_v9, %v1892_v0 }
0x1780   :  { %v2846_v16 = vpop.eup %2845 }
0x1781   :  { %v1915_v22 = vmul.f32 %v2371_v15, %v1908_v4  ;;  %v1909_v31 = vmul.f32 %v2846_v16, %v1893_v50 }
0x1783   :  { %v1916_v34 = vmul.f32 %v2371_v15, %v1909_v31  ;;  %v1922_v6 = vadd.f32 %v2372_v17, %v1915_v22  ;;  %v2388_v15 = vld [vmem:[#allocation5 + $0x80] ss:$0 sm:$0xff] }
0x1785   :  { %v1923_v18 = vadd.f32 %v2372_v17, %v1916_v34 }
0x1787   :  { %v1924_v19 = vpack.c.bf16 %v1923_v18, %v1922_v6 }
0x1789   :  { %2700 = vmatmul.mubr.msk.bf16.vlgmr.msra.gmra.mrb[48].mxu0 %vm172_vm8, %v1924_v19  ;;  %v2240_v19 = vld [vmem:[%s3326_s1] sm:$0xff]  ;;  %s2941_s1 = smov [#allocation7]  }
0x178a   :  { %2727 = vmatprep.mubr.msk.bf16.mxu0 %vm2939_vm0, %v2938_v1  ;;  %2724 = vmatpush3.bf16.msra.mxu0 %v2797_v51  ;;  %vm2215_vm0 = vcmask 523264  }
0x178b   :  { %2725 = vmatprep.subr.bf16.mxu0 %v2938_v1 }
0x178e   :  { %2726 = vmatpush3.bf16.msra.mxu0 %v2798_v5 }
0x185c   :  { %v1983_v21 = vpop.f32.mrb[48].mxu0 }
0x185d   :  { %v1984_v23 = vadd.f32 %v2373_v59, %v1983_v21  ;;  %v2701_v24 = vpop.f32.mrb[49].mxu0 }
0x185e   :  { %v1986_v26 = vpop.f32.mrb[50].mxu0 }
0x185f   :  { %v1987_v27 = vadd.f32 %v2373_v59, %v1986_v26  ;;  %v2702_v28 = vpop.f32.mrb[51].mxu0  ;;  %v1990_v29 = vmax.f32 %v1984_v23, 0.0 }
0x1861   :  { %v1991_v30 = vmax.f32 %v1987_v27, 0.0 }
0x1863   :  { %v1992_v12 = vpack.c.bf16 %v1991_v30, %v1990_v29 }
0x1865   :  { %2720 = vmatmul.mubr.bf16.vlgmr.msra.gmra.mrb[60].mxu1 %v1992_v12 }
0x1938   :  { %v2091_v32 = vpop.f32.mrb[60].mxu1 }
0x1939   :  { %v2098_v13 = vadd.f32 %v2091_v32, %v3258_v41  ;;  %v2721_v35 = vpop.f32.mrb[61].mxu1 }
0x193a   :  { %v2094_v36 = vpop.f32.mrb[62].mxu1 }
0x193b   :  { %v2099_v10 = vadd.f32 %v2094_v36, %v3261_v43  ;;  %v2722_v37 = vpop.f32.mrb[63].mxu1  ;;  %v2105_v11 = vadd.f32 %v2385_v33, %v2098_v13 }
0x193d   :  { %v2107_v39 = vsel %vm172_vm8, %v2105_v11, 0.0  ;;  %v2106_v40 = vadd.f32 %v2385_v33, %v2099_v10 }
0x193e   :  { %2108 = vadd.xlane.f32.xlu1 %v2107_v39 }
0x193f   :  { %v2110_v42 = vsel %vm172_vm8, %v2106_v40, 0.0 }
0x1940   :  { %2111 = vadd.xlane.f32.xlu0 %v2110_v42 }
0x19cb   :  { %v2109_v44 = vpop.xlane.xlu1 %2108 }
0x19cc   :  { %v2113_v45 = vmul.f32 0.03125, %v2109_v44 }
0x19cd   :  { %v2112_v46 = vpop.xlane.xlu0 %2111 }
0x19ce   :  { %v2115_v47 = vsub.f32 %v2105_v11, %v2113_v45  ;;  %v2114_v48 = vmul.f32 0.03125, %v2112_v46 }
0x19d0   :  { %v2116_v0 = vsub.f32 %v2106_v40, %v2114_v48  ;;  %v2117_v41 = vmul.f32 %v2115_v47, %v2115_v47 }
0x19d2   :  { %v2119_v49 = vsel %vm172_vm8, %v2117_v41, 0.0  ;;  %v2118_v50 = vmul.f32 %v2116_v0, %v2116_v0 }
0x19d3   :  { %2120 = vadd.xlane.f32.xlu1 %v2119_v49 }
0x19d4   :  { %v2122_v43 = vsel %vm172_vm8, %v2118_v50, 0.0 }
0x19d5   :  { %2123 = vadd.xlane.f32.xlu0 %v2122_v43 }
0x1a60   :  { %v2121_v52 = vpop.xlane.xlu1 %2120 }
0x1a61   :  { %v2125_v53 = vmul.f32 0.03125, %v2121_v52 }
0x1a62   :  { %v2124_v54 = vpop.xlane.xlu0 %2123 }
0x1a63   :  { %v2127_v38 = vadd.f32 1e-05, %v2125_v53  ;;  %v2126_v55 = vmul.f32 0.03125, %v2124_v54 }
0x1a65   :  { %2847 = vrsqrt.f32 %v2127_v38  ;;  %v2128_v56 = vadd.f32 1e-05, %v2126_v55 }
0x1a67   :  { %2849 = vrsqrt.f32 %v2128_v56 }
0x1a6f   :  { %v2848_v57 = vpop.eup %2847 }
0x1a70   :  { %v2131_v60 = vmul.f32 %v2848_v57, %v2115_v47 }
0x1a71   :  { %v2850_v61 = vpop.eup %2849 }
0x1a72   :  { %v2138_v62 = vmul.f32 %v2386_v58, %v2131_v60  ;;  %v2132_v63 = vmul.f32 %v2850_v61, %v2116_v0 }
0x1a74   :  { %v2139_v3 = vmul.f32 %v2386_v58, %v2132_v63  ;;  %v2145_v7 = vadd.f32 %v2387_v2, %v2138_v62 }
0x1a76   :  { %v2146_v8 = vadd.f32 %v2387_v2, %v2139_v3 }
0x1a78   :  { %v2147_v9 = vpack.c.bf16 %v2146_v8, %v2145_v7 }
0x1a7a   :  { %2728 = vmatmul.mubr.msk.bf16.vlgmr.msra.gmra.mrb[52].mxu0 %vm172_vm8, %v2147_v9 }
0x1b4d   :  { %v2206_v4 = vpop.f32.mrb[52].mxu0 }
0x1b4e   :  { %v2207_v16 = vadd.f32 %v2388_v15, %v2206_v4  ;;  %v2729_v22 = vpop.f32.mrb[53].mxu0 }
0x1b4f   :  { %v2209_v31 = vpop.f32.mrb[54].mxu0 }
0x1b50   :  { %2213 = vst [vmem:[%s3329_s4] sm:$0xff] %v2207_v16  ;;  %v2210_v17 = vadd.f32 %v2388_v15, %v2209_v31  ;;  %v2730_v34 = vpop.f32.mrb[55].mxu0  ;;  %v2216_v6 = vsel %vm2215_vm0, %v2207_v16, -inf }
0x1b51   :  { %2217 = vmax.xlane.f32.xlu1 %v2216_v6 }
0x1b52   :  { %2214 = vst [vmem:[%s3329_s4 + $0x8] sm:$0xff] %v2210_v17  ;;  %v2219_v18 = vsel %vm2215_vm0, %v2210_v17, -inf  ;;  %s2280_s4 = sshll.u32 %s2941_s1, 4  ;;  %s2281_s4 = int_to_ptr.vmem [resolvable:$true] %s2280_s4 }
0x1b53   :  { %2220 = vmax.xlane.f32.xlu0 %v2219_v18  ;;  %s2903_s30 = scalar_lea.vmem %s2281_s4, 16  ;;  %s2907_s6 = scalar_lea.vmem %s2281_s4, 32 }
0x1b54   :  { %p2904_p2 = scmp.ne.s32.totalorder %s2281_s4, %s2903_s30  ;;  %p2908_p3 = scmp.lt.s32.totalorder %s2281_s4, %s2281_s4 }
0x1b55   :  { %p2909_p4 = scmp.lt.s32.totalorder %s2907_s6, %s2903_s30 }
0x1b57   :  { %p2910_p5 = por %p2909_p4, %p2908_p3 }
0x1b59   :  { %p2911_p6 = pnand %p2910_p5, %p2904_p2 }
0x1b62   :  { %2243 = vperm.xlu1 %2743, %v2240_v19  }
0x1b69   :  { %2246 = vperm.xlu0 %2742, %v2241_v25  }
0x1bde   :  { %v2218_v20 = vpop.xlane.xlu1 %2217 }
0x1bdf   :  { %v2222_v59 = vsub.f32 %v2207_v16, %v2218_v20 }
0x1be0   :  { %v2221_v21 = vpop.xlane.xlu0 %2220 }
0x1be1   :  { %v2224_v23 = vmul.f32 1.442695, %v2222_v59  ;;  %v2223_v24 = vsub.f32 %v2210_v17, %v2221_v21 }
0x1be2   :  { %v2244_v27 = vpop.permute.xlu1 %2243 }
0x1be3   :  { %2851 = vpow2.f32 %v2224_v23  ;;  %v2226_v26 = vmul.f32 1.442695, %v2223_v24  ;;  %vm2248_vm1 = vcmp.eq.s32.totalorder %v3020_v14, %v2244_v27 }
0x1be4   :  { %v2250_v29 = vsel %vm2248_vm1, 1.0, %v2938_v1 }
0x1be5   :  { %2853 = vpow2.f32 %v2226_v26  ;;  %v2252_v33 = vmul.f32 %v2250_v29, %v2207_v16 }
0x1be7   :  { %v2254_v10 = vsel %vm2215_vm0, %v2252_v33, 0.0 }
0x1be8   :  { %v2247_v28 = vpop.permute.xlu0 %2246 }
0x1be9   :  { %vm2249_vm2 = vcmp.eq.s32.totalorder %v3020_v14, %v2247_v28 }
0x1bea   :  { %v2251_v12 = vsel %vm2249_vm2, 1.0, %v2938_v1 }
0x1beb   :  { %v2253_v36 = vmul.f32 %v2251_v12, %v2210_v17 }
0x1bed   :  { %v2852_v30 = vpop.eup %2851  ;;  %v2257_v37 = vsel %vm2215_vm0, %v2253_v36, 0.0 }
0x1bee   :  { %v2228_v32 = vsel %vm2215_vm0, %v2852_v30, 0.0 }
0x1bef   :  { %v2854_v13 = vpop.eup %2853  ;;  %2229 = vadd.xlane.f32.xlu1 %v2228_v32 }
0x1bf0   :  { %v2231_v35 = vsel %vm2215_vm0, %v2854_v13, 0.0 }
0x1bf1   :  { %2232 = vadd.xlane.f32.xlu0 %v2231_v35 }
0x1bf3   :  { %2255 = vadd.xlane.f32.xlu1 %v2254_v10 }
0x1bf5   :  { %2258 = vadd.xlane.f32.xlu0 %v2257_v37 }
0x1c7c   :  { %v2230_v14 = vpop.xlane.xlu1 %2229 }
0x1c7d   :  { %2855 = vlog2.f32 %v2230_v14 }
0x1c7e   :  { %v2233_v11 = vpop.xlane.xlu0 %2232 }
0x1c7f   :  { %2857 = vlog2.f32 %v2233_v11 }
0x1c80   :  { %v2256_v46 = vpop.xlane.xlu1 %2255 }
0x1c82   :  { %v2259_v47 = vpop.xlane.xlu0 %2258 }
0x1c87   :  { %v2856_v1 = vpop.eup %2855 }
0x1c88   :  { %v2235_v39 = vmul.f32 0.6931472, %v2856_v1 }
0x1c89   :  { %v2858_v40 = vpop.eup %2857 }
0x1c8a   :  { %v2237_v42 = vmul.f32 0.6931472, %v2858_v40  ;;  %v2238_v44 = vadd.f32 %v2235_v39, %v2218_v20 }
0x1c8c   :  { %v2239_v45 = vadd.f32 %v2237_v42, %v2221_v21  ;;  %v2260_v48 = vsub.f32 %v2238_v44, %v2256_v46 }
0x1c8e   :  { %v2261_v0 = vsub.f32 %v2239_v45, %v2259_v47 }
0x1c90   :  { %v2262_v41 = vadd.f32 %v2261_v0, %v2260_v48 }
0x1c92   :  { %v2263_v49 = vrot.slane %v2262_v41, 4 }
0x1c94   :  { %v2264_v50 = vadd.f32 %v2263_v49, %v2262_v41 }
0x1c96   :  { %v2265_v43 = vrot.slane %v2264_v50, 2 }
0x1c98   :  { %v2266_v51 = vadd.f32 %v2265_v43, %v2264_v50 }
0x1c9a   :  { %v2267_v5 = vrot.slane %v2266_v51, 1 }
0x1c9c   :  { %v2268_v52 = vadd.f32 %v2267_v5, %v2266_v51 }
0x1c9e   :  { %v2269_v53 = vmul.f32 0.0625, %v2268_v52 }
0x1ca0   :  { %2271 = vst.msk [vmem:[#allocation7] sm:$0x1] %vm2270_vm3, %v2269_v53 }
0x1ca1   :  { %2914 = shalt.err (!%p2911_p6)
}
0x1ca2   :  { %s2915_s9 = scalar_lea.hbm %s3330_s5, 16 }
0x1ca3   :  { %p2916_p7 = scmp.ne.s32.totalorder %s3330_s5, %s2915_s9  ;;  %p2919_p8 = scmp.lt.u32.totalorder %s2915_s9, %s3330_s5 }
0x1ca5   :  { %p2921_p9 = pnand %p2919_p8, %p2916_p7 }
0x1ca7   :  { %2924 = shalt.err (!%p2921_p9)
}
0x1ca8   :  { %2283 = dma.vmem_to_hbm [thread:$0]  %s2281_s4, 16, %s3330_s5, [#allocation4]  }
0x1ca9   :  { %2929 = dma.done.wait [#allocation4], 16  }
0x1caa   :  { %2930 = vsyncadd [#allocation4], 4294967280 }
0x1cab   :  { %2289 = vsyncpa [#allocation3], 1 }
0x1cac   :  { %2290 = vsyncpa [#allocation6], 1 }
0x1cad   :  { %2291 = vsyncpa [#allocation4], 1 }

</bundles_post_ra>
